<compile_context>
chip_gen: v7x
topology: tpu7x:2x2x1
jax: 0.10.0
libtpu: 0.0.40
codegen_flags: <defaults>
</compile_context>

<pallas_src>
import functools

import numpy as np
import jax
import jax.numpy as jnp
from jax import lax
from jax.experimental import pallas as pl
from jax.experimental.pallas import tpu as pltpu


# ----------------------------------------------------------------------------
# pltpu.roll semantics probe (which way a positive shift moves elements).
# ----------------------------------------------------------------------------
@functools.lru_cache(maxsize=None)
def _probe_roll():
    """Returns (use_hw_roll, hw_roll_matches_jnp_roll)."""

    def probe_kernel(x_ref, o_ref):
        o_ref[...] = pltpu.roll(x_ref[...], 1, 1)

    try:
        x = jnp.tile(jnp.arange(128, dtype=jnp.float32)[None, :], (8, 1))
        out = pl.pallas_call(
            probe_kernel,
            out_shape=jax.ShapeDtypeStruct((8, 128), jnp.float32))(x)
        v = float(np.asarray(out)[0, 0])
        if v == 127.0:          # jnp.roll convention: out[0] == x[-1]
            return True, True
        if v == 1.0:            # opposite convention
            return True, False
    except Exception:           # defensive: fall back to jnp.roll in-kernel
        pass
    return False, True


def _make_shift_fn(use_hw_roll, hw_matches_jnp):
    """shift_fn(x, s, Lp) -> y with y[:, q] = x[:, q + s] for the lanes we keep."""

    def shift_fn(x, s, Lp):
        k = (-s) % Lp
        if k == 0:
            return x
        if use_hw_roll:
            return pltpu.roll(x, k if hw_matches_jnp else Lp - k, axis=1)
        return jnp.roll(x, k, axis=1)

    return shift_fn


# ----------------------------------------------------------------------------
# Kernel: one (n, output-depth-slice) per grid step.
# ----------------------------------------------------------------------------
def _make_kernel(Wp, Lp, Cout, shift_fn):
    def kernel(x0_ref, x1_ref, x2_ref, w_ref, b_ref, p_ref, o_ref):
        # x0/x1/x2 : (Cin, Lp) bf16 -- padded depth slices d, d+1, d+2
        # w_ref    : (27, Cout, Cin) bf16, tap t = kd*9 + kh*3 + kw
        # b_ref    : (Cout, 1) f32 conv bias
        # p_ref    : (Cout, 1) f32 per-batch temb projection
        # o_ref    : (Cout, Lp) f32 -- conv output in flattened padded (Hp,Wp) coords
        planes = (x0_ref, x1_ref, x2_ref)
        acc = jnp.zeros((Cout, Lp), jnp.float32)
        for kd in range(3):
            xp = planes[kd][...]
            for kh in range(3):
                for kw in range(3):
                    s = (kh - 1) * Wp + (kw - 1)           # lane offset of this tap
                    xs = shift_fn(xp, s, Lp)
                    t = kd * 9 + kh * 3 + kw
                    acc = acc + jnp.dot(w_ref[t], xs,
                                        preferred_element_type=jnp.float32)
        y = acc + b_ref[...]                # conv bias BEFORE activation
        y = jnp.maximum(y, 0.1 * y)         # LeakyReLU(0.1)
        o_ref[...] = (y + p_ref[...]).astype(o_ref.dtype)   # temb add AFTER activation

    return kernel


# ----------------------------------------------------------------------------
# Wrapper
# ----------------------------------------------------------------------------
def conv_block_temb_one_stage(x, temb, conv_w, conv_b, lin_w, lin_b):
    """x: (N, Cin, D, H, W) f32 (NCDHW); temb: (N, 512). Returns (N, Cout, D, H, W)."""
    N, Cin, D, H, W = x.shape
    Cout = conv_w.shape[0]
    Dp, Hp, Wp = D + 2, H + 2, W + 2
    L = Hp * Wp
    Lp = ((L + 127) // 128) * 128

    # ---- layout plumbing only (no im2col, no per-voxel compute hoisting) ----
    x_pad = jnp.pad(x, ((0, 0), (0, 0), (1, 1), (1, 1), (1, 1)))
    x_lin = jnp.transpose(x_pad, (0, 2, 1, 3, 4)).reshape(N, Dp, Cin, L)
    x_lin = jnp.pad(x_lin, ((0, 0), (0, 0), (0, 0), (0, Lp - L)))
    x_lin = x_lin.astype(jnp.bfloat16)                       # (N, Dp, Cin, Lp)

    # conv weights (Cout, Cin, 3,3,3) -> (27, Cout, Cin), tap t = kd*9+kh*3+kw
    w27 = jnp.transpose(conv_w, (2, 3, 4, 0, 1)).reshape(27, Cout, Cin)
    w27 = w27.astype(jnp.bfloat16)
    b2 = conv_b.reshape(Cout, 1).astype(jnp.float32)

    # temb path hoisted (one tiny XLA matmul): silu(temb) @ lin_w.T + lin_b
    te = temb.astype(jnp.float32)
    proj = (te * jax.nn.sigmoid(te)) @ lin_w.T.astype(jnp.float32) + lin_b
    proj3 = proj.reshape(N, Cout, 1).astype(jnp.float32)

    use_hw_roll, hw_like_jnp = _probe_roll()
    kernel = _make_kernel(Wp, Lp, Cout, _make_shift_fn(use_hw_roll, hw_like_jnp))

    # VMEM budget: 3 double-buffered x slices + double-buffered output + weights.
    step_bytes = (2 * (3 * Cin * Lp * 2 + Cout * Lp * 4)
                  + 2 * 27 * Cout * Cin * 2 + 4 * Cout * 4)
    vmem_limit = int(min(48 * 2 ** 20, max(8 * 2 ** 20, 4 * step_bytes)))

    out = pl.pallas_call(
        kernel,
        out_shape=jax.ShapeDtypeStruct((N, D, Cout, Lp), jnp.float32),
        grid_spec=pltpu.PrefetchScalarGridSpec(
            num_scalar_prefetch=0,
            grid=(N, D),
            in_specs=[
                pl.BlockSpec((None, None, Cin, Lp), lambda n, d: (n, d, 0, 0)),
                pl.BlockSpec((None, None, Cin, Lp), lambda n, d: (n, d + 1, 0, 0)),
                pl.BlockSpec((None, None, Cin, Lp), lambda n, d: (n, d + 2, 0, 0)),
                pl.BlockSpec((27, Cout, Cin),       lambda n, d: (0, 0, 0)),
                pl.BlockSpec((Cout, 1),             lambda n, d: (0, 0)),
                pl.BlockSpec((None, Cout, 1),       lambda n, d: (n, 0, 0)),
            ],
            out_specs=pl.BlockSpec((None, None, Cout, Lp),
                                   lambda n, d: (n, d, 0, 0)),
        ),
        compiler_params=pltpu.CompilerParams(
            dimension_semantics=("parallel", "parallel"),
            vmem_limit_bytes=vmem_limit),
    )(x_lin, x_lin, x_lin, w27, b2, proj3)

    # Drop lane padding, keep the (h, w) interior, back to NCDHW.
    out = out[:, :, :, :L].reshape(N, D, Cout, Hp, Wp)[:, :, :, 1:H + 1, 1:W + 1]
    return jnp.transpose(out, (0, 2, 1, 3, 4))


# ----------------------------------------------------------------------------
# Pure-JAX reference (f32)
# ----------------------------------------------------------------------------
def _reference(x, temb, conv_w, conv_b, lin_w, lin_b):
    conv = lax.conv_general_dilated(
        x, conv_w, window_strides=(1, 1, 1), padding="SAME",
        dimension_numbers=("NCDHW", "OIDHW", "NCDHW"))
    conv = conv + conv_b[None, :, None, None, None]
    act = jnp.where(conv >= 0, conv, 0.1 * conv)
    te = temb * jax.nn.sigmoid(temb)
    proj = te @ lin_w.T + lin_b
    return act + proj[:, :, None, None, None]


if __name__ == "__main__":
    key = jax.random.PRNGKey(0)
    ks = jax.random.split(key, 6)

    N, Cin, Cout, D, H, W = 2, 4, 8, 8, 8, 8

    x = jax.random.normal(ks[0], (N, Cin, D, H, W), dtype=jnp.float32)
    temb = jax.random.normal(ks[1], (N, 512), dtype=jnp.float32)

    # deterministic synthetic parameters (shapes from the module __init__)
    conv_w = 0.1 * jax.random.normal(ks[2], (Cout, Cin, 3, 3, 3), dtype=jnp.float32)
    conv_b = 0.1 * jax.random.normal(ks[3], (Cout,), dtype=jnp.float32)
    lin_w = 0.05 * jax.random.normal(ks[4], (Cout, 512), dtype=jnp.float32)
    lin_b = 0.05 * jax.random.normal(ks[5], (Cout,), dtype=jnp.float32)

    out = conv_block_temb_one_stage(x, temb, conv_w, conv_b, lin_w, lin_b)
    out = jax.block_until_ready(out)

    ref = _reference(x, temb, conv_w, conv_b, lin_w, lin_b)
    # bf16 matmul operands with f32 accumulation -> loosened tolerance.
    np.testing.assert_allclose(np.asarray(out), np.asarray(ref),
                               rtol=2e-2, atol=2e-2)
    print("KERNEL_OK")
</pallas_src>

<mosaic_0001>
module attributes {stable_mosaic.version = 11 : i64} {
  func.func @probe_kernel(%arg0: memref<8x128xf32, #tpu.memory_space<vmem>>, %arg1: memref<8x128xf32, #tpu.memory_space<vmem>>) attributes {dimension_semantics = [], scalar_prefetch = 0 : i64, scratch_operands = 0 : i64, tpu.core_type = #tpu.core_type<tc>} {
    %c0 = arith.constant 0 : index
    %c0_0 = arith.constant 0 : index
    %0 = vector.load %arg0[%c0, %c0_0] : memref<8x128xf32, #tpu.memory_space<vmem>>, vector<8x128xf32>
    %c1_i32 = arith.constant 1 : i32
    %1 = tpu.dynamic_rotate %0 by %c1_i32 dim 1 : vector<8x128xf32>, i32 -> vector<8x128xf32>
    %c0_1 = arith.constant 0 : index
    %c0_2 = arith.constant 0 : index
    %2 = vector.load %arg1[%c0_1, %c0_2] : memref<8x128xf32, #tpu.memory_space<vmem>>, vector<8x128xf32>
    tpu.vector_store %arg1[%c0_1, %c0_2], %1 {strides = array<i32>} : memref<8x128xf32, #tpu.memory_space<vmem>>, vector<8x128xf32>,
    return
  }
}

module attributes {stable_mosaic.version = 11 : i64} {
  func.func @kernel(%arg0: i32, %arg1: i32, %arg2: memref<1x1x4x128xbf16, #tpu.memory_space<vmem>>, %arg3: memref<1x1x4x128xbf16, #tpu.memory_space<vmem>>, %arg4: memref<1x1x4x128xbf16, #tpu.memory_space<vmem>>, %arg5: memref<27x8x4xbf16, #tpu.memory_space<vmem>>, %arg6: memref<8x1xf32, #tpu.memory_space<vmem>>, %arg7: memref<1x8x1xf32, #tpu.memory_space<vmem>>, %arg8: memref<1x1x8x128xf32, #tpu.memory_space<vmem>>) attributes {dimension_semantics = [#tpu.dimension_semantics<parallel>, #tpu.dimension_semantics<parallel>], iteration_bounds = array<i64: 2, 8>, scalar_prefetch = 0 : i64, scratch_operands = 0 : i64, tpu.core_type = #tpu.core_type<tc>, window_params = [{transform_indices = @transform_0, window_bounds = array<i64: 1, 1, 4, 128>}, {transform_indices = @transform_1, window_bounds = array<i64: 1, 1, 4, 128>}, {transform_indices = @transform_2, window_bounds = array<i64: 1, 1, 4, 128>}, {pipeline_mode = #tpu.pipeline_mode<synchronous>, transform_indices = @transform_3, window_bounds = array<i64: 27, 8, 4>}, {pipeline_mode = #tpu.pipeline_mode<synchronous>, transform_indices = @transform_4, window_bounds = array<i64: 8, 1>}, {transform_indices = @transform_5, window_bounds = array<i64: 1, 8, 1>}, {transform_indices = @transform_6, window_bounds = array<i64: 1, 1, 8, 128>}]} {
    %cst = arith.constant 0.000000e+00 : f32
    %0 = vector.broadcast %cst : f32 to vector<8x128xf32>
    %c0 = arith.constant 0 : index
    %c0_0 = arith.constant 0 : index
    %c0_1 = arith.constant 0 : index
    %c0_2 = arith.constant 0 : index
    %1 = vector.load %arg2[%c0, %c0_0, %c0_1, %c0_2] : memref<1x1x4x128xbf16, #tpu.memory_space<vmem>>, vector<1x1x4x128xbf16>
    %2 = vector.shape_cast %1 : vector<1x1x4x128xbf16> to vector<4x128xbf16>
    %3 = vector.extract_strided_slice %2 {offsets = [0, 117], sizes = [4, 11], strides = [1, 1]} : vector<4x128xbf16> to vector<4x11xbf16>
    %4 = vector.extract_strided_slice %2 {offsets = [0, 0], sizes = [4, 117], strides = [1, 1]} : vector<4x128xbf16> to vector<4x117xbf16>
    %5 = tpu.concatenate %3, %4 in 1 : vector<4x11xbf16>, vector<4x117xbf16> -> vector<4x128xbf16>
    %c0_3 = arith.constant 0 : index
    %c0_4 = arith.constant 0 : index
    %c0_5 = arith.constant 0 : index
    %6 = vector.load %arg5[%c0_3, %c0_4, %c0_5] : memref<27x8x4xbf16, #tpu.memory_space<vmem>>, vector<1x8x4xbf16>
    %7 = vector.shape_cast %6 : vector<1x8x4xbf16> to vector<8x4xbf16>
    %cst_6 = arith.constant dense<0.000000e+00> : vector<8x128xf32>
    %8 = tpu.matmul %7, %5, %cst_6 {dimension_numbers = #tpu.dot_dimension_numbers<[1], [0], [0], [1], [0, 0, 1, 1], [], []>} : vector<8x4xbf16>, vector<4x128xbf16>, vector<8x128xf32> -> vector<8x128xf32>
    %9 = arith.addf %0, %8 : vector<8x128xf32>
    %10 = vector.extract_strided_slice %2 {offsets = [0, 118], sizes = [4, 10], strides = [1, 1]} : vector<4x128xbf16> to vector<4x10xbf16>
    %11 = vector.extract_strided_slice %2 {offsets = [0, 0], sizes = [4, 118], strides = [1, 1]} : vector<4x128xbf16> to vector<4x118xbf16>
    %12 = tpu.concatenate %10, %11 in 1 : vector<4x10xbf16>, vector<4x118xbf16> -> vector<4x128xbf16>
    %c1 = arith.constant 1 : index
    %c0_7 = arith.constant 0 : index
    %c0_8 = arith.constant 0 : index
    %13 = vector.load %arg5[%c1, %c0_7, %c0_8] : memref<27x8x4xbf16, #tpu.memory_space<vmem>>, vector<1x8x4xbf16>
    %14 = vector.shape_cast %13 : vector<1x8x4xbf16> to vector<8x4xbf16>
    %cst_9 = arith.constant dense<0.000000e+00> : vector<8x128xf32>
    %15 = tpu.matmul %14, %12, %cst_9 {dimension_numbers = #tpu.dot_dimension_numbers<[1], [0], [0], [1], [0, 0, 1, 1], [], []>} : vector<8x4xbf16>, vector<4x128xbf16>, vector<8x128xf32> -> vector<8x128xf32>
    %16 = arith.addf %9, %15 : vector<8x128xf32>
    %17 = vector.extract_strided_slice %2 {offsets = [0, 119], sizes = [4, 9], strides = [1, 1]} : vector<4x128xbf16> to vector<4x9xbf16>
    %18 = vector.extract_strided_slice %2 {offsets = [0, 0], sizes = [4, 119], strides = [1, 1]} : vector<4x128xbf16> to vector<4x119xbf16>
    %19 = tpu.concatenate %17, %18 in 1 : vector<4x9xbf16>, vector<4x119xbf16> -> vector<4x128xbf16>
    %c2 = arith.constant 2 : index
    %c0_10 = arith.constant 0 : index
    %c0_11 = arith.constant 0 : index
    %20 = vector.load %arg5[%c2, %c0_10, %c0_11] : memref<27x8x4xbf16, #tpu.memory_space<vmem>>, vector<1x8x4xbf16>
    %21 = vector.shape_cast %20 : vector<1x8x4xbf16> to vector<8x4xbf16>
    %cst_12 = arith.constant dense<0.000000e+00> : vector<8x128xf32>
    %22 = tpu.matmul %21, %19, %cst_12 {dimension_numbers = #tpu.dot_dimension_numbers<[1], [0], [0], [1], [0, 0, 1, 1], [], []>} : vector<8x4xbf16>, vector<4x128xbf16>, vector<8x128xf32> -> vector<8x128xf32>
    %23 = arith.addf %16, %22 : vector<8x128xf32>
    %24 = vector.extract_strided_slice %2 {offsets = [0, 127], sizes = [4, 1], strides = [1, 1]} : vector<4x128xbf16> to vector<4x1xbf16>
    %25 = vector.extract_strided_slice %2 {offsets = [0, 0], sizes = [4, 127], strides = [1, 1]} : vector<4x128xbf16> to vector<4x127xbf16>
    %26 = tpu.concatenate %24, %25 in 1 : vector<4x1xbf16>, vector<4x127xbf16> -> vector<4x128xbf16>
    %c3 = arith.constant 3 : index
    %c0_13 = arith.constant 0 : index
    %c0_14 = arith.constant 0 : index
    %27 = vector.load %arg5[%c3, %c0_13, %c0_14] : memref<27x8x4xbf16, #tpu.memory_space<vmem>>, vector<1x8x4xbf16>
    %28 = vector.shape_cast %27 : vector<1x8x4xbf16> to vector<8x4xbf16>
    %cst_15 = arith.constant dense<0.000000e+00> : vector<8x128xf32>
    %29 = tpu.matmul %28, %26, %cst_15 {dimension_numbers = #tpu.dot_dimension_numbers<[1], [0], [0], [1], [0, 0, 1, 1], [], []>} : vector<8x4xbf16>, vector<4x128xbf16>, vector<8x128xf32> -> vector<8x128xf32>
    %30 = arith.addf %23, %29 : vector<8x128xf32>
    %c4 = arith.constant 4 : index
    %c0_16 = arith.constant 0 : index
    %c0_17 = arith.constant 0 : index
    %31 = vector.load %arg5[%c4, %c0_16, %c0_17] : memref<27x8x4xbf16, #tpu.memory_space<vmem>>, vector<1x8x4xbf16>
    %32 = vector.shape_cast %31 : vector<1x8x4xbf16> to vector<8x4xbf16>
    %cst_18 = arith.constant dense<0.000000e+00> : vector<8x128xf32>
    %33 = tpu.matmul %32, %2, %cst_18 {dimension_numbers = #tpu.dot_dimension_numbers<[1], [0], [0], [1], [0, 0, 1, 1], [], []>} : vector<8x4xbf16>, vector<4x128xbf16>, vector<8x128xf32> -> vector<8x128xf32>
    %34 = arith.addf %30, %33 : vector<8x128xf32>
    %35 = vector.extract_strided_slice %2 {offsets = [0, 1], sizes = [4, 127], strides = [1, 1]} : vector<4x128xbf16> to vector<4x127xbf16>
    %36 = vector.extract_strided_slice %2 {offsets = [0, 0], sizes = [4, 1], strides = [1, 1]} : vector<4x128xbf16> to vector<4x1xbf16>
    %37 = tpu.concatenate %35, %36 in 1 : vector<4x127xbf16>, vector<4x1xbf16> -> vector<4x128xbf16>
    %c5 = arith.constant 5 : index
    %c0_19 = arith.constant 0 : index
    %c0_20 = arith.constant 0 : index
    %38 = vector.load %arg5[%c5, %c0_19, %c0_20] : memref<27x8x4xbf16, #tpu.memory_space<vmem>>, vector<1x8x4xbf16>
    %39 = vector.shape_cast %38 : vector<1x8x4xbf16> to vector<8x4xbf16>
    %cst_21 = arith.constant dense<0.000000e+00> : vector<8x128xf32>
    %40 = tpu.matmul %39, %37, %cst_21 {dimension_numbers = #tpu.dot_dimension_numbers<[1], [0], [0], [1], [0, 0, 1, 1], [], []>} : vector<8x4xbf16>, vector<4x128xbf16>, vector<8x128xf32> -> vector<8x128xf32>
    %41 = arith.addf %34, %40 : vector<8x128xf32>
    %42 = vector.extract_strided_slice %2 {offsets = [0, 9], sizes = [4, 119], strides = [1, 1]} : vector<4x128xbf16> to vector<4x119xbf16>
    %43 = vector.extract_strided_slice %2 {offsets = [0, 0], sizes = [4, 9], strides = [1, 1]} : vector<4x128xbf16> to vector<4x9xbf16>
    %44 = tpu.concatenate %42, %43 in 1 : vector<4x119xbf16>, vector<4x9xbf16> -> vector<4x128xbf16>
    %c6 = arith.constant 6 : index
    %c0_22 = arith.constant 0 : index
    %c0_23 = arith.constant 0 : index
    %45 = vector.load %arg5[%c6, %c0_22, %c0_23] : memref<27x8x4xbf16, #tpu.memory_space<vmem>>, vector<1x8x4xbf16>
    %46 = vector.shape_cast %45 : vector<1x8x4xbf16> to vector<8x4xbf16>
    %cst_24 = arith.constant dense<0.000000e+00> : vector<8x128xf32>
    %47 = tpu.matmul %46, %44, %cst_24 {dimension_numbers = #tpu.dot_dimension_numbers<[1], [0], [0], [1], [0, 0, 1, 1], [], []>} : vector<8x4xbf16>, vector<4x128xbf16>, vector<8x128xf32> -> vector<8x128xf32>
    %48 = arith.addf %41, %47 : vector<8x128xf32>
    %49 = vector.extract_strided_slice %2 {offsets = [0, 10], sizes = [4, 118], strides = [1, 1]} : vector<4x128xbf16> to vector<4x118xbf16>
    %50 = vector.extract_strided_slice %2 {offsets = [0, 0], sizes = [4, 10], strides = [1, 1]} : vector<4x128xbf16> to vector<4x10xbf16>
    %51 = tpu.concatenate %49, %50 in 1 : vector<4x118xbf16>, vector<4x10xbf16> -> vector<4x128xbf16>
    %c7 = arith.constant 7 : index
    %c0_25 = arith.constant 0 : index
    %c0_26 = arith.constant 0 : index
    %52 = vector.load %arg5[%c7, %c0_25, %c0_26] : memref<27x8x4xbf16, #tpu.memory_space<vmem>>, vector<1x8x4xbf16>
    %53 = vector.shape_cast %52 : vector<1x8x4xbf16> to vector<8x4xbf16>
    %cst_27 = arith.constant dense<0.000000e+00> : vector<8x128xf32>
    %54 = tpu.matmul %53, %51, %cst_27 {dimension_numbers = #tpu.dot_dimension_numbers<[1], [0], [0], [1], [0, 0, 1, 1], [], []>} : vector<8x4xbf16>, vector<4x128xbf16>, vector<8x128xf32> -> vector<8x128xf32>
    %55 = arith.addf %48, %54 : vector<8x128xf32>
    %56 = vector.extract_strided_slice %2 {offsets = [0, 11], sizes = [4, 117], strides = [1, 1]} : vector<4x128xbf16> to vector<4x117xbf16>
    %57 = vector.extract_strided_slice %2 {offsets = [0, 0], sizes = [4, 11], strides = [1, 1]} : vector<4x128xbf16> to vector<4x11xbf16>
    %58 = tpu.concatenate %56, %57 in 1 : vector<4x117xbf16>, vector<4x11xbf16> -> vector<4x128xbf16>
    %c8 = arith.constant 8 : index
    %c0_28 = arith.constant 0 : index
    %c0_29 = arith.constant 0 : index
    %59 = vector.load %arg5[%c8, %c0_28, %c0_29] : memref<27x8x4xbf16, #tpu.memory_space<vmem>>, vector<1x8x4xbf16>
    %60 = vector.shape_cast %59 : vector<1x8x4xbf16> to vector<8x4xbf16>
    %cst_30 = arith.constant dense<0.000000e+00> : vector<8x128xf32>
    %61 = tpu.matmul %60, %58, %cst_30 {dimension_numbers = #tpu.dot_dimension_numbers<[1], [0], [0], [1], [0, 0, 1, 1], [], []>} : vector<8x4xbf16>, vector<4x128xbf16>, vector<8x128xf32> -> vector<8x128xf32>
    %62 = arith.addf %55, %61 : vector<8x128xf32>
    %c0_31 = arith.constant 0 : index
    %c0_32 = arith.constant 0 : index
    %c0_33 = arith.constant 0 : index
    %c0_34 = arith.constant 0 : index
    %63 = vector.load %arg3[%c0_31, %c0_32, %c0_33, %c0_34] : memref<1x1x4x128xbf16, #tpu.memory_space<vmem>>, vector<1x1x4x128xbf16>
    %64 = vector.shape_cast %63 : vector<1x1x4x128xbf16> to vector<4x128xbf16>
    %65 = vector.extract_strided_slice %64 {offsets = [0, 117], sizes = [4, 11], strides = [1, 1]} : vector<4x128xbf16> to vector<4x11xbf16>
    %66 = vector.extract_strided_slice %64 {offsets = [0, 0], sizes = [4, 117], strides = [1, 1]} : vector<4x128xbf16> to vector<4x117xbf16>
    %67 = tpu.concatenate %65, %66 in 1 : vector<4x11xbf16>, vector<4x117xbf16> -> vector<4x128xbf16>
    %c9 = arith.constant 9 : index
    %c0_35 = arith.constant 0 : index
    %c0_36 = arith.constant 0 : index
    %68 = vector.load %arg5[%c9, %c0_35, %c0_36] : memref<27x8x4xbf16, #tpu.memory_space<vmem>>, vector<1x8x4xbf16>
    %69 = vector.shape_cast %68 : vector<1x8x4xbf16> to vector<8x4xbf16>
    %cst_37 = arith.constant dense<0.000000e+00> : vector<8x128xf32>
    %70 = tpu.matmul %69, %67, %cst_37 {dimension_numbers = #tpu.dot_dimension_numbers<[1], [0], [0], [1], [0, 0, 1, 1], [], []>} : vector<8x4xbf16>, vector<4x128xbf16>, vector<8x128xf32> -> vector<8x128xf32>
    %71 = arith.addf %62, %70 : vector<8x128xf32>
    %72 = vector.extract_strided_slice %64 {offsets = [0, 118], sizes = [4, 10], strides = [1, 1]} : vector<4x128xbf16> to vector<4x10xbf16>
    %73 = vector.extract_strided_slice %64 {offsets = [0, 0], sizes = [4, 118], strides = [1, 1]} : vector<4x128xbf16> to vector<4x118xbf16>
    %74 = tpu.concatenate %72, %73 in 1 : vector<4x10xbf16>, vector<4x118xbf16> -> vector<4x128xbf16>
    %c10 = arith.constant 10 : index
    %c0_38 = arith.constant 0 : index
    %c0_39 = arith.constant 0 : index
    %75 = vector.load %arg5[%c10, %c0_38, %c0_39] : memref<27x8x4xbf16, #tpu.memory_space<vmem>>, vector<1x8x4xbf16>
    %76 = vector.shape_cast %75 : vector<1x8x4xbf16> to vector<8x4xbf16>
    %cst_40 = arith.constant dense<0.000000e+00> : vector<8x128xf32>
    %77 = tpu.matmul %76, %74, %cst_40 {dimension_numbers = #tpu.dot_dimension_numbers<[1], [0], [0], [1], [0, 0, 1, 1], [], []>} : vector<8x4xbf16>, vector<4x128xbf16>, vector<8x128xf32> -> vector<8x128xf32>
    %78 = arith.addf %71, %77 : vector<8x128xf32>
    %79 = vector.extract_strided_slice %64 {offsets = [0, 119], sizes = [4, 9], strides = [1, 1]} : vector<4x128xbf16> to vector<4x9xbf16>
    %80 = vector.extract_strided_slice %64 {offsets = [0, 0], sizes = [4, 119], strides = [1, 1]} : vector<4x128xbf16> to vector<4x119xbf16>
    %81 = tpu.concatenate %79, %80 in 1 : vector<4x9xbf16>, vector<4x119xbf16> -> vector<4x128xbf16>
    %c11 = arith.constant 11 : index
    %c0_41 = arith.constant 0 : index
    %c0_42 = arith.constant 0 : index
    %82 = vector.load %arg5[%c11, %c0_41, %c0_42] : memref<27x8x4xbf16, #tpu.memory_space<vmem>>, vector<1x8x4xbf16>
    %83 = vector.shape_cast %82 : vector<1x8x4xbf16> to vector<8x4xbf16>
    %cst_43 = arith.constant dense<0.000000e+00> : vector<8x128xf32>
    %84 = tpu.matmul %83, %81, %cst_43 {dimension_numbers = #tpu.dot_dimension_numbers<[1], [0], [0], [1], [0, 0, 1, 1], [], []>} : vector<8x4xbf16>, vector<4x128xbf16>, vector<8x128xf32> -> vector<8x128xf32>
    %85 = arith.addf %78, %84 : vector<8x128xf32>
    %86 = vector.extract_strided_slice %64 {offsets = [0, 127], sizes = [4, 1], strides = [1, 1]} : vector<4x128xbf16> to vector<4x1xbf16>
    %87 = vector.extract_strided_slice %64 {offsets = [0, 0], sizes = [4, 127], strides = [1, 1]} : vector<4x128xbf16> to vector<4x127xbf16>
    %88 = tpu.concatenate %86, %87 in 1 : vector<4x1xbf16>, vector<4x127xbf16> -> vector<4x128xbf16>
    %c12 = arith.constant 12 : index
    %c0_44 = arith.constant 0 : index
    %c0_45 = arith.constant 0 : index
    %89 = vector.load %arg5[%c12, %c0_44, %c0_45] : memref<27x8x4xbf16, #tpu.memory_space<vmem>>, vector<1x8x4xbf16>
    %90 = vector.shape_cast %89 : vector<1x8x4xbf16> to vector<8x4xbf16>
    %cst_46 = arith.constant dense<0.000000e+00> : vector<8x128xf32>
    %91 = tpu.matmul %90, %88, %cst_46 {dimension_numbers = #tpu.dot_dimension_numbers<[1], [0], [0], [1], [0, 0, 1, 1], [], []>} : vector<8x4xbf16>, vector<4x128xbf16>, vector<8x128xf32> -> vector<8x128xf32>
    %92 = arith.addf %85, %91 : vector<8x128xf32>
    %c13 = arith.constant 13 : index
    %c0_47 = arith.constant 0 : index
    %c0_48 = arith.constant 0 : index
    %93 = vector.load %arg5[%c13, %c0_47, %c0_48] : memref<27x8x4xbf16, #tpu.memory_space<vmem>>, vector<1x8x4xbf16>
    %94 = vector.shape_cast %93 : vector<1x8x4xbf16> to vector<8x4xbf16>
    %cst_49 = arith.constant dense<0.000000e+00> : vector<8x128xf32>
    %95 = tpu.matmul %94, %64, %cst_49 {dimension_numbers = #tpu.dot_dimension_numbers<[1], [0], [0], [1], [0, 0, 1, 1], [], []>} : vector<8x4xbf16>, vector<4x128xbf16>, vector<8x128xf32> -> vector<8x128xf32>
    %96 = arith.addf %92, %95 : vector<8x128xf32>
    %97 = vector.extract_strided_slice %64 {offsets = [0, 1], sizes = [4, 127], strides = [1, 1]} : vector<4x128xbf16> to vector<4x127xbf16>
    %98 = vector.extract_strided_slice %64 {offsets = [0, 0], sizes = [4, 1], strides = [1, 1]} : vector<4x128xbf16> to vector<4x1xbf16>
    %99 = tpu.concatenate %97, %98 in 1 : vector<4x127xbf16>, vector<4x1xbf16> -> vector<4x128xbf16>
    %c14 = arith.constant 14 : index
    %c0_50 = arith.constant 0 : index
    %c0_51 = arith.constant 0 : index
    %100 = vector.load %arg5[%c14, %c0_50, %c0_51] : memref<27x8x4xbf16, #tpu.memory_space<vmem>>, vector<1x8x4xbf16>
    %101 = vector.shape_cast %100 : vector<1x8x4xbf16> to vector<8x4xbf16>
    %cst_52 = arith.constant dense<0.000000e+00> : vector<8x128xf32>
    %102 = tpu.matmul %101, %99, %cst_52 {dimension_numbers = #tpu.dot_dimension_numbers<[1], [0], [0], [1], [0, 0, 1, 1], [], []>} : vector<8x4xbf16>, vector<4x128xbf16>, vector<8x128xf32> -> vector<8x128xf32>
    %103 = arith.addf %96, %102 : vector<8x128xf32>
    %104 = vector.extract_strided_slice %64 {offsets = [0, 9], sizes = [4, 119], strides = [1, 1]} : vector<4x128xbf16> to vector<4x119xbf16>
    %105 = vector.extract_strided_slice %64 {offsets = [0, 0], sizes = [4, 9], strides = [1, 1]} : vector<4x128xbf16> to vector<4x9xbf16>
    %106 = tpu.concatenate %104, %105 in 1 : vector<4x119xbf16>, vector<4x9xbf16> -> vector<4x128xbf16>
    %c15 = arith.constant 15 : index
    %c0_53 = arith.constant 0 : index
    %c0_54 = arith.constant 0 : index
    %107 = vector.load %arg5[%c15, %c0_53, %c0_54] : memref<27x8x4xbf16, #tpu.memory_space<vmem>>, vector<1x8x4xbf16>
    %108 = vector.shape_cast %107 : vector<1x8x4xbf16> to vector<8x4xbf16>
    %cst_55 = arith.constant dense<0.000000e+00> : vector<8x128xf32>
    %109 = tpu.matmul %108, %106, %cst_55 {dimension_numbers = #tpu.dot_dimension_numbers<[1], [0], [0], [1], [0, 0, 1, 1], [], []>} : vector<8x4xbf16>, vector<4x128xbf16>, vector<8x128xf32> -> vector<8x128xf32>
    %110 = arith.addf %103, %109 : vector<8x128xf32>
    %111 = vector.extract_strided_slice %64 {offsets = [0, 10], sizes = [4, 118], strides = [1, 1]} : vector<4x128xbf16> to vector<4x118xbf16>
    %112 = vector.extract_strided_slice %64 {offsets = [0, 0], sizes = [4, 10], strides = [1, 1]} : vector<4x128xbf16> to vector<4x10xbf16>
    %113 = tpu.concatenate %111, %112 in 1 : vector<4x118xbf16>, vector<4x10xbf16> -> vector<4x128xbf16>
    %c16 = arith.constant 16 : index
    %c0_56 = arith.constant 0 : index
    %c0_57 = arith.constant 0 : index
    %114 = vector.load %arg5[%c16, %c0_56, %c0_57] : memref<27x8x4xbf16, #tpu.memory_space<vmem>>, vector<1x8x4xbf16>
    %115 = vector.shape_cast %114 : vector<1x8x4xbf16> to vector<8x4xbf16>
    %cst_58 = arith.constant dense<0.000000e+00> : vector<8x128xf32>
    %116 = tpu.matmul %115, %113, %cst_58 {dimension_numbers = #tpu.dot_dimension_numbers<[1], [0], [0], [1], [0, 0, 1, 1], [], []>} : vector<8x4xbf16>, vector<4x128xbf16>, vector<8x128xf32> -> vector<8x128xf32>
    %117 = arith.addf %110, %116 : vector<8x128xf32>
    %118 = vector.extract_strided_slice %64 {offsets = [0, 11], sizes = [4, 117], strides = [1, 1]} : vector<4x128xbf16> to vector<4x117xbf16>
    %119 = vector.extract_strided_slice %64 {offsets = [0, 0], sizes = [4, 11], strides = [1, 1]} : vector<4x128xbf16> to vector<4x11xbf16>
    %120 = tpu.concatenate %118, %119 in 1 : vector<4x117xbf16>, vector<4x11xbf16> -> vector<4x128xbf16>
    %c17 = arith.constant 17 : index
    %c0_59 = arith.constant 0 : index
    %c0_60 = arith.constant 0 : index
    %121 = vector.load %arg5[%c17, %c0_59, %c0_60] : memref<27x8x4xbf16, #tpu.memory_space<vmem>>, vector<1x8x4xbf16>
    %122 = vector.shape_cast %121 : vector<1x8x4xbf16> to vector<8x4xbf16>
    %cst_61 = arith.constant dense<0.000000e+00> : vector<8x128xf32>
    %123 = tpu.matmul %122, %120, %cst_61 {dimension_numbers = #tpu.dot_dimension_numbers<[1], [0], [0], [1], [0, 0, 1, 1], [], []>} : vector<8x4xbf16>, vector<4x128xbf16>, vector<8x128xf32> -> vector<8x128xf32>
    %124 = arith.addf %117, %123 : vector<8x128xf32>
    %c0_62 = arith.constant 0 : index
    %c0_63 = arith.constant 0 : index
    %c0_64 = arith.constant 0 : index
    %c0_65 = arith.constant 0 : index
    %125 = vector.load %arg4[%c0_62, %c0_63, %c0_64, %c0_65] : memref<1x1x4x128xbf16, #tpu.memory_space<vmem>>, vector<1x1x4x128xbf16>
    %126 = vector.shape_cast %125 : vector<1x1x4x128xbf16> to vector<4x128xbf16>
    %127 = vector.extract_strided_slice %126 {offsets = [0, 117], sizes = [4, 11], strides = [1, 1]} : vector<4x128xbf16> to vector<4x11xbf16>
    %128 = vector.extract_strided_slice %126 {offsets = [0, 0], sizes = [4, 117], strides = [1, 1]} : vector<4x128xbf16> to vector<4x117xbf16>
    %129 = tpu.concatenate %127, %128 in 1 : vector<4x11xbf16>, vector<4x117xbf16> -> vector<4x128xbf16>
    %c18 = arith.constant 18 : index
    %c0_66 = arith.constant 0 : index
    %c0_67 = arith.constant 0 : index
    %130 = vector.load %arg5[%c18, %c0_66, %c0_67] : memref<27x8x4xbf16, #tpu.memory_space<vmem>>, vector<1x8x4xbf16>
    %131 = vector.shape_cast %130 : vector<1x8x4xbf16> to vector<8x4xbf16>
    %cst_68 = arith.constant dense<0.000000e+00> : vector<8x128xf32>
    %132 = tpu.matmul %131, %129, %cst_68 {dimension_numbers = #tpu.dot_dimension_numbers<[1], [0], [0], [1], [0, 0, 1, 1], [], []>} : vector<8x4xbf16>, vector<4x128xbf16>, vector<8x128xf32> -> vector<8x128xf32>
    %133 = arith.addf %124, %132 : vector<8x128xf32>
    %134 = vector.extract_strided_slice %126 {offsets = [0, 118], sizes = [4, 10], strides = [1, 1]} : vector<4x128xbf16> to vector<4x10xbf16>
    %135 = vector.extract_strided_slice %126 {offsets = [0, 0], sizes = [4, 118], strides = [1, 1]} : vector<4x128xbf16> to vector<4x118xbf16>
    %136 = tpu.concatenate %134, %135 in 1 : vector<4x10xbf16>, vector<4x118xbf16> -> vector<4x128xbf16>
    %c19 = arith.constant 19 : index
    %c0_69 = arith.constant 0 : index
    %c0_70 = arith.constant 0 : index
    %137 = vector.load %arg5[%c19, %c0_69, %c0_70] : memref<27x8x4xbf16, #tpu.memory_space<vmem>>, vector<1x8x4xbf16>
    %138 = vector.shape_cast %137 : vector<1x8x4xbf16> to vector<8x4xbf16>
    %cst_71 = arith.constant dense<0.000000e+00> : vector<8x128xf32>
    %139 = tpu.matmul %138, %136, %cst_71 {dimension_numbers = #tpu.dot_dimension_numbers<[1], [0], [0], [1], [0, 0, 1, 1], [], []>} : vector<8x4xbf16>, vector<4x128xbf16>, vector<8x128xf32> -> vector<8x128xf32>
    %140 = arith.addf %133, %139 : vector<8x128xf32>
    %141 = vector.extract_strided_slice %126 {offsets = [0, 119], sizes = [4, 9], strides = [1, 1]} : vector<4x128xbf16> to vector<4x9xbf16>
    %142 = vector.extract_strided_slice %126 {offsets = [0, 0], sizes = [4, 119], strides = [1, 1]} : vector<4x128xbf16> to vector<4x119xbf16>
    %143 = tpu.concatenate %141, %142 in 1 : vector<4x9xbf16>, vector<4x119xbf16> -> vector<4x128xbf16>
    %c20 = arith.constant 20 : index
    %c0_72 = arith.constant 0 : index
    %c0_73 = arith.constant 0 : index
    %144 = vector.load %arg5[%c20, %c0_72, %c0_73] : memref<27x8x4xbf16, #tpu.memory_space<vmem>>, vector<1x8x4xbf16>
    %145 = vector.shape_cast %144 : vector<1x8x4xbf16> to vector<8x4xbf16>
    %cst_74 = arith.constant dense<0.000000e+00> : vector<8x128xf32>
    %146 = tpu.matmul %145, %143, %cst_74 {dimension_numbers = #tpu.dot_dimension_numbers<[1], [0], [0], [1], [0, 0, 1, 1], [], []>} : vector<8x4xbf16>, vector<4x128xbf16>, vector<8x128xf32> -> vector<8x128xf32>
    %147 = arith.addf %140, %146 : vector<8x128xf32>
    %148 = vector.extract_strided_slice %126 {offsets = [0, 127], sizes = [4, 1], strides = [1, 1]} : vector<4x128xbf16> to vector<4x1xbf16>
    %149 = vector.extract_strided_slice %126 {offsets = [0, 0], sizes = [4, 127], strides = [1, 1]} : vector<4x128xbf16> to vector<4x127xbf16>
    %150 = tpu.concatenate %148, %149 in 1 : vector<4x1xbf16>, vector<4x127xbf16> -> vector<4x128xbf16>
    %c21 = arith.constant 21 : index
    %c0_75 = arith.constant 0 : index
    %c0_76 = arith.constant 0 : index
    %151 = vector.load %arg5[%c21, %c0_75, %c0_76] : memref<27x8x4xbf16, #tpu.memory_space<vmem>>, vector<1x8x4xbf16>
    %152 = vector.shape_cast %151 : vector<1x8x4xbf16> to vector<8x4xbf16>
    %cst_77 = arith.constant dense<0.000000e+00> : vector<8x128xf32>
    %153 = tpu.matmul %152, %150, %cst_77 {dimension_numbers = #tpu.dot_dimension_numbers<[1], [0], [0], [1], [0, 0, 1, 1], [], []>} : vector<8x4xbf16>, vector<4x128xbf16>, vector<8x128xf32> -> vector<8x128xf32>
    %154 = arith.addf %147, %153 : vector<8x128xf32>
    %c22 = arith.constant 22 : index
    %c0_78 = arith.constant 0 : index
    %c0_79 = arith.constant 0 : index
    %155 = vector.load %arg5[%c22, %c0_78, %c0_79] : memref<27x8x4xbf16, #tpu.memory_space<vmem>>, vector<1x8x4xbf16>
    %156 = vector.shape_cast %155 : vector<1x8x4xbf16> to vector<8x4xbf16>
    %cst_80 = arith.constant dense<0.000000e+00> : vector<8x128xf32>
    %157 = tpu.matmul %156, %126, %cst_80 {dimension_numbers = #tpu.dot_dimension_numbers<[1], [0], [0], [1], [0, 0, 1, 1], [], []>} : vector<8x4xbf16>, vector<4x128xbf16>, vector<8x128xf32> -> vector<8x128xf32>
    %158 = arith.addf %154, %157 : vector<8x128xf32>
    %159 = vector.extract_strided_slice %126 {offsets = [0, 1], sizes = [4, 127], strides = [1, 1]} : vector<4x128xbf16> to vector<4x127xbf16>
    %160 = vector.extract_strided_slice %126 {offsets = [0, 0], sizes = [4, 1], strides = [1, 1]} : vector<4x128xbf16> to vector<4x1xbf16>
    %161 = tpu.concatenate %159, %160 in 1 : vector<4x127xbf16>, vector<4x1xbf16> -> vector<4x128xbf16>
    %c23 = arith.constant 23 : index
    %c0_81 = arith.constant 0 : index
    %c0_82 = arith.constant 0 : index
    %162 = vector.load %arg5[%c23, %c0_81, %c0_82] : memref<27x8x4xbf16, #tpu.memory_space<vmem>>, vector<1x8x4xbf16>
    %163 = vector.shape_cast %162 : vector<1x8x4xbf16> to vector<8x4xbf16>
    %cst_83 = arith.constant dense<0.000000e+00> : vector<8x128xf32>
    %164 = tpu.matmul %163, %161, %cst_83 {dimension_numbers = #tpu.dot_dimension_numbers<[1], [0], [0], [1], [0, 0, 1, 1], [], []>} : vector<8x4xbf16>, vector<4x128xbf16>, vector<8x128xf32> -> vector<8x128xf32>
    %165 = arith.addf %158, %164 : vector<8x128xf32>
    %166 = vector.extract_strided_slice %126 {offsets = [0, 9], sizes = [4, 119], strides = [1, 1]} : vector<4x128xbf16> to vector<4x119xbf16>
    %167 = vector.extract_strided_slice %126 {offsets = [0, 0], sizes = [4, 9], strides = [1, 1]} : vector<4x128xbf16> to vector<4x9xbf16>
    %168 = tpu.concatenate %166, %167 in 1 : vector<4x119xbf16>, vector<4x9xbf16> -> vector<4x128xbf16>
    %c24 = arith.constant 24 : index
    %c0_84 = arith.constant 0 : index
    %c0_85 = arith.constant 0 : index
    %169 = vector.load %arg5[%c24, %c0_84, %c0_85] : memref<27x8x4xbf16, #tpu.memory_space<vmem>>, vector<1x8x4xbf16>
    %170 = vector.shape_cast %169 : vector<1x8x4xbf16> to vector<8x4xbf16>
    %cst_86 = arith.constant dense<0.000000e+00> : vector<8x128xf32>
    %171 = tpu.matmul %170, %168, %cst_86 {dimension_numbers = #tpu.dot_dimension_numbers<[1], [0], [0], [1], [0, 0, 1, 1], [], []>} : vector<8x4xbf16>, vector<4x128xbf16>, vector<8x128xf32> -> vector<8x128xf32>
    %172 = arith.addf %165, %171 : vector<8x128xf32>
    %173 = vector.extract_strided_slice %126 {offsets = [0, 10], sizes = [4, 118], strides = [1, 1]} : vector<4x128xbf16> to vector<4x118xbf16>
    %174 = vector.extract_strided_slice %126 {offsets = [0, 0], sizes = [4, 10], strides = [1, 1]} : vector<4x128xbf16> to vector<4x10xbf16>
    %175 = tpu.concatenate %173, %174 in 1 : vector<4x118xbf16>, vector<4x10xbf16> -> vector<4x128xbf16>
    %c25 = arith.constant 25 : index
    %c0_87 = arith.constant 0 : index
    %c0_88 = arith.constant 0 : index
    %176 = vector.load %arg5[%c25, %c0_87, %c0_88] : memref<27x8x4xbf16, #tpu.memory_space<vmem>>, vector<1x8x4xbf16>
    %177 = vector.shape_cast %176 : vector<1x8x4xbf16> to vector<8x4xbf16>
    %cst_89 = arith.constant dense<0.000000e+00> : vector<8x128xf32>
    %178 = tpu.matmul %177, %175, %cst_89 {dimension_numbers = #tpu.dot_dimension_numbers<[1], [0], [0], [1], [0, 0, 1, 1], [], []>} : vector<8x4xbf16>, vector<4x128xbf16>, vector<8x128xf32> -> vector<8x128xf32>
    %179 = arith.addf %172, %178 : vector<8x128xf32>
    %180 = vector.extract_strided_slice %126 {offsets = [0, 11], sizes = [4, 117], strides = [1, 1]} : vector<4x128xbf16> to vector<4x117xbf16>
    %181 = vector.extract_strided_slice %126 {offsets = [0, 0], sizes = [4, 11], strides = [1, 1]} : vector<4x128xbf16> to vector<4x11xbf16>
    %182 = tpu.concatenate %180, %181 in 1 : vector<4x117xbf16>, vector<4x11xbf16> -> vector<4x128xbf16>
    %c26 = arith.constant 26 : index
    %c0_90 = arith.constant 0 : index
    %c0_91 = arith.constant 0 : index
    %183 = vector.load %arg5[%c26, %c0_90, %c0_91] : memref<27x8x4xbf16, #tpu.memory_space<vmem>>, vector<1x8x4xbf16>
    %184 = vector.shape_cast %183 : vector<1x8x4xbf16> to vector<8x4xbf16>
    %cst_92 = arith.constant dense<0.000000e+00> : vector<8x128xf32>
    %185 = tpu.matmul %184, %182, %cst_92 {dimension_numbers = #tpu.dot_dimension_numbers<[1], [0], [0], [1], [0, 0, 1, 1], [], []>} : vector<8x4xbf16>, vector<4x128xbf16>, vector<8x128xf32> -> vector<8x128xf32>
    %186 = arith.addf %179, %185 : vector<8x128xf32>
    %c0_93 = arith.constant 0 : index
    %c0_94 = arith.constant 0 : index
    %187 = vector.load %arg6[%c0_93, %c0_94] : memref<8x1xf32, #tpu.memory_space<vmem>>, vector<8x1xf32>
    %188 = vector.broadcast %187 : vector<8x1xf32> to vector<8x128xf32>
    %189 = arith.addf %186, %188 : vector<8x128xf32>
    %cst_95 = arith.constant 1.000000e-01 : f32
    %190 = vector.broadcast %cst_95 : f32 to vector<8x128xf32>
    %191 = arith.mulf %190, %189 : vector<8x128xf32>
    %192 = arith.maximumf %189, %191 : vector<8x128xf32>
    %c0_96 = arith.constant 0 : index
    %c0_97 = arith.constant 0 : index
    %c0_98 = arith.constant 0 : index
    %193 = vector.load %arg7[%c0_96, %c0_97, %c0_98] : memref<1x8x1xf32, #tpu.memory_space<vmem>>, vector<1x8x1xf32>
    %194 = vector.shape_cast %193 : vector<1x8x1xf32> to vector<8x1xf32>
    %195 = vector.broadcast %194 : vector<8x1xf32> to vector<8x128xf32>
    %196 = arith.addf %192, %195 : vector<8x128xf32>
    %c0_99 = arith.constant 0 : index
    %c0_100 = arith.constant 0 : index
    %c0_101 = arith.constant 0 : index
    %c0_102 = arith.constant 0 : index
    %197 = vector.load %arg8[%c0_99, %c0_100, %c0_101, %c0_102] : memref<1x1x8x128xf32, #tpu.memory_space<vmem>>, vector<1x1x8x128xf32>
    %198 = vector.shape_cast %197 : vector<1x1x8x128xf32> to vector<8x128xf32>
    %199 = vector.shape_cast %196 : vector<8x128xf32> to vector<1x1x8x128xf32>
    tpu.vector_store %arg8[%c0_99, %c0_100, %c0_101, %c0_102], %199 {strides = array<i32>} : memref<1x1x8x128xf32, #tpu.memory_space<vmem>>, vector<1x1x8x128xf32>,
    return
  }
  func.func @transform_0(%arg0: i32, %arg1: i32) -> (i32, i32, i32, i32) {
    %c0_i32 = arith.constant 0 : i32
    %c0_i32_0 = arith.constant 0 : i32
    %c0_i32_1 = arith.constant 0 : i32
    return %arg0, %arg1, %c0_i32, %c0_i32_0 : i32, i32, i32, i32
  }
  func.func @transform_1(%arg0: i32, %arg1: i32) -> (i32, i32, i32, i32) {
    %c1_i32 = arith.constant 1 : i32
    %0 = arith.addi %arg1, %c1_i32 : i32
    %c0_i32 = arith.constant 0 : i32
    %c0_i32_0 = arith.constant 0 : i32
    %c0_i32_1 = arith.constant 0 : i32
    return %arg0, %0, %c0_i32, %c0_i32_0 : i32, i32, i32, i32
  }
  func.func @transform_2(%arg0: i32, %arg1: i32) -> (i32, i32, i32, i32) {
    %c2_i32 = arith.constant 2 : i32
    %0 = arith.addi %arg1, %c2_i32 : i32
    %c0_i32 = arith.constant 0 : i32
    %c0_i32_0 = arith.constant 0 : i32
    %c0_i32_1 = arith.constant 0 : i32
    return %arg0, %0, %c0_i32, %c0_i32_0 : i32, i32, i32, i32
  }
  func.func @transform_3(%arg0: i32, %arg1: i32) -> (i32, i32, i32) {
    %c0_i32 = arith.constant 0 : i32
    %c0_i32_0 = arith.constant 0 : i32
    %c0_i32_1 = arith.constant 0 : i32
    %c0_i32_2 = arith.constant 0 : i32
    return %c0_i32, %c0_i32_0, %c0_i32_1 : i32, i32, i32
  }
  func.func @transform_4(%arg0: i32, %arg1: i32) -> (i32, i32) {
    %c0_i32 = arith.constant 0 : i32
    %c0_i32_0 = arith.constant 0 : i32
    %c0_i32_1 = arith.constant 0 : i32
    return %c0_i32, %c0_i32_0 : i32, i32
  }
  func.func @transform_5(%arg0: i32, %arg1: i32) -> (i32, i32, i32) {
    %c0_i32 = arith.constant 0 : i32
    %c0_i32_0 = arith.constant 0 : i32
    %c0_i32_1 = arith.constant 0 : i32
    return %arg0, %c0_i32, %c0_i32_0 : i32, i32, i32
  }
  func.func @transform_6(%arg0: i32, %arg1: i32) -> (i32, i32, i32, i32) {
    %c0_i32 = arith.constant 0 : i32
    %c0_i32_0 = arith.constant 0 : i32
    %c0_i32_1 = arith.constant 0 : i32
    return %arg0, %arg1, %c0_i32, %c0_i32_0 : i32, i32, i32, i32
  }
}

</mosaic_0001>

<bundles_post_ra>
// kernel: tpu_custom_call.1
= control target key start
LH: loop header
LB: loop body
LE: loop exit
PB: predicated region body
PF: predicated region fallthrough
CT: control target
= control target key end

     0   :  { %6 = vsyncpa [#allocation3], 0  ;;  %s128_s0 = inlined_call_operand.hbm [shape: f32[8,128], index: 0, kind: input, shape index: {}]   ;;  %s129_s1 = inlined_call_operand.hbm [shape: f32[8,128], index: 1, kind: output, shape index: {}]  }
   0x1   :  { %7 = vsyncpa [#allocation4], 0  ;;  %s91_s6 = smov [#allocation2]   ;;  %s43_s10 = scalar_lea.hbm %s128_s0, 128 }
   0x2   :  { %s14_s7 = sshll.u32 %s91_s6, 4  ;;  %p44_p0 = scmp.ne.s32.totalorder %s128_s0, %s43_s10  ;;  %s15_s7 = int_to_ptr.vmem [resolvable:$true] %s14_s7 }
   0x3   :  { %p47_p1 = scmp.lt.u32.totalorder %s43_s10, %s128_s0 }
   0x5   :  { %p49_p2 = pnand %p47_p1, %p44_p0 }
   0x7   :  { %52 = shalt.err (!%p49_p2)
}
   0x8   :  { %s53_s15 = scalar_lea.vmem %s15_s7, 128  ;;  %p58_p4 = scmp.lt.s32.totalorder %s15_s7, %s15_s7 }
   0x9   :  { %p54_p3 = scmp.ne.s32.totalorder %s15_s7, %s53_s15  ;;  %p59_p5 = scmp.lt.s32.totalorder %s53_s15, %s53_s15 }
   0xb   :  { %p60_p6 = por %p59_p5, %p58_p4 }
   0xd   :  { %p61_p7 = pnand %p60_p6, %p54_p3 }
   0xf   :  { %64 = shalt.err (!%p61_p7)
}
  0x10   :  { %17 = dma.hbm_to_vmem [thread:$0]  %s128_s0, 128, %s15_s7, [#allocation3]  }
  0x11   :  { %87 = dma.done.wait [#allocation3], 128  }
  0x12   :  { %88 = vsyncadd [#allocation3], 4294967168  ;;  %v21_v0 = vld [vmem:[#allocation2] sm:$0xff]  ;;  %s92_s18 = smov 1   ;;  %s93_s19 = smov [#allocation5]  }
  0x13   :  { %22 = vrot.lane.b32.xlu0 %v21_v0, %s92_s18  ;;  %s31_s20 = sshll.u32 %s93_s19, 4  ;;  %s32_s20 = int_to_ptr.vmem [resolvable:$true] %s31_s20 }
  0x14   :  { %s65_s21 = scalar_lea.vmem %s32_s20, 128  ;;  %p70_p9 = scmp.lt.s32.totalorder %s32_s20, %s32_s20 }
  0x15   :  { %p66_p8 = scmp.ne.s32.totalorder %s32_s20, %s65_s21  ;;  %p71_p10 = scmp.lt.s32.totalorder %s65_s21, %s65_s21 }
  0x17   :  { %p72_p11 = por %p71_p10, %p70_p9 }
  0x19   :  { %p73_p12 = pnand %p72_p11, %p66_p8 }
  0x85   :  { %v23_v1 = vpop.permute.xlu0 %22 }
  0x86   :  { %24 = vst [vmem:[#allocation5] sm:$0xff] %v23_v1 }
  0x87   :  { %76 = shalt.err (!%p73_p12)
}
  0x88   :  { %s77_s0 = scalar_lea.hbm %s129_s1, 128 }
  0x89   :  { %p78_p13 = scmp.ne.s32.totalorder %s129_s1, %s77_s0  ;;  %p81_p0 = scmp.lt.u32.totalorder %s77_s0, %s129_s1 }
  0x8b   :  { %p83_p1 = pnand %p81_p0, %p78_p13 }
  0x8d   :  { %86 = shalt.err (!%p83_p1)
}
  0x8e   :  { %34 = dma.vmem_to_hbm [thread:$0]  %s32_s20, 128, %s129_s1, [#allocation4]  }
  0x8f   :  { %89 = dma.done.wait [#allocation4], 128  }
  0x90   :  { %90 = vsyncadd [#allocation4], 4294967168 }
  0x91   :  { %38 = vsyncpa [#allocation3], 1 }
  0x92   :  { %39 = vsyncpa [#allocation4], 1 }

// kernel: tpu_custom_call.1
= control target key start
LH: loop header
LB: loop body
LE: loop exit
PB: predicated region body
PF: predicated region fallthrough
CT: control target
= control target key end

     0   :  { %s2839_s0 = inlined_call_operand.vmem [shape: bf16[2,10,4,128], index: 0, kind: input, shape index: {}]   ;;  %s2840_s1 = inlined_call_operand.vmem [shape: bf16[2,10,4,128], index: 1, kind: input, shape index: {}]   ;;  %s2841_s2 = inlined_call_operand.vmem [shape: bf16[2,10,4,128], index: 2, kind: input, shape index: {}]   ;;  %s2842_s3 = inlined_call_operand.vmem [shape: bf16[27,8,4], index: 3, kind: input, shape index: {}]   ;;  %s2843_s4 = inlined_call_operand.vmem [shape: f32[8,1], index: 4, kind: input, shape index: {}]   ;;  %s2844_s5 = inlined_call_operand.vmem [shape: f32[2,8,1], index: 5, kind: input, shape index: {}]   ;;  %s2845_s6 = inlined_call_operand.hbm [shape: f32[2,8,8,128], index: 6, kind: output, shape index: {}]  }
   0x1   :  { %2853 = sst [smem:[#allocation8_spill]] %s2839_s0 }
   0x2   :  { %2854 = sst [smem:[#allocation9_spill]] %s2840_s1 }
   0x3   :  { %11 = vsyncpa [#allocation3], 0 }
   0x4   :  { %13 = vsyncpa [#allocation3 + $0x1], 0  ;;  %s2439_s21 = smov 0   ;;  %s2441_s22 = smov 0  }
   0x5   :  { %s2443_s23 = smov 0   ;;  %s2445_s24 = smov 0  }
   0x6   :  { %s2447_s25 = smov 0   ;;  %s2449_s26 = smov 0  }
   0x7   :  { %s2451_s27 = smov 0   ;;  %s2453_s28 = smov 0  }
   0x8 LB: > { %2855 = sst [smem:[#allocation5_spill]] %s2385_s27  ;;  %s1925_s29 = sadd.s32 4294967295, %s2389_s28   ;;  %s2389_s28 = sphi %s2453_s28, %s19_s28   ;;  %s2385_s27 = sphi %s2451_s27, %s2866_s27   ;;  %s2381_s26 = sphi %s2449_s26, %s2871_s26   ;;  %s2377_s25 = sphi %s2447_s25, %s2864_s25   ;;  %s2373_s24 = sphi %s2445_s24, %s2870_s24   ;;  %s2369_s23 = sphi %s2443_s23, %s2869_s23   ;;  %s2365_s22 = sphi %s2441_s22, %s2868_s22   ;;  %s2361_s21 = sphi %s2439_s21, %s2867_s21  }
   0x9   : > { %s1926_s30 = sadd.s32 4294967294, %s2389_s28   ;;  %s28_s7 = sadd.s32 1, %s2381_s26 }
   0xa   : > { %p29_p0 = scmp.ge.s32.totalorder %s28_s7, 8  ;;  %s31_s8 = sadd.s32 1, %s2385_s27 }
   0xb   : > { %p206_p1 = scmp.ne.s32.totalorder %s2369_s23, %s2365_s22  ;;  %p207_p2 = scmp.eq.s32.totalorder %s1925_s29, 15 }
   0xc   : > { %s2873_s7 = smov (%p29_p0, %s28_s7), 0  ;;  %s2875_s8 = smov (!%p29_p0, %s31_s8), %s2385_s27 }
   0xd   : > { %2856 = sst [smem:[#allocation6_spill]] %s2873_s7  ;;  %s192_s9 = ssub.s32 %s2381_s26, %s2873_s7 }
   0xe   : > { %p2490_p3 = por %p207_p2, %p206_p1  ;;  %p33_p4 = scmp.ge.s32.totalorder %s2875_s8, 2 }
   0xf   : > { %p212_p5 = scmp.ne.s32.totalorder %s2365_s22, %s2361_s21  ;;  %p213_p6 = scmp.eq.s32.totalorder %s1926_s30, 15 }
  0x10   : > { %p1929_p7 = scmp.ge.s32.totalorder %s2389_s28, 1  ;;  %s2877_s8 = smov (%p33_p4, %s2875_s8), 0 }
  0x11   : > { %2858 = sst [smem:[#allocation7_spill]] %s2877_s8  ;;  %p2499_p8 = por %p213_p6, %p212_p5 }
  0x12   : > { %p281_p9 = scmp.lt.s32.totalorder %s2389_s28, 17  ;;  %s191_s12 = ssub.s32 %s2385_s27, %s2877_s8 }
  0x13   : > { %s196_s13 = sadd.s32 1, %s2369_s23  ;;  %s193_s14 = sor.u32 %s192_s9, %s191_s12 }
  0x14   : > { %p282_p10 = pnand %p1929_p7, %p281_p9  ;;  %p194_p11 = scmp.eq.s32.totalorder %s193_s14, 0 }
  0x15   : > { %p336_p12 = scmp.lt.s32.totalorder (!%p282_p10), %s2377_s25, 1  ;;  %p338_p13 = scmp.lt.s32.totalorder (!%p282_p10), %s2373_s24, 9  ;;  %v374_v0 = vlaneseq (!%p282_p10)  ;;  %v2391_v1 = vmov (!%p282_p10), 1983009808   ;;  %v2392_v3 = vmov (!%p282_p10), 0.0   ;;  %vm2393_vm0 = vmmov (!%p282_p10), 0  }
  0x16   : > { %s2508_s15 = scalar_select %p194_p11, %s2369_s23, %s196_s13  }
  0x17   : > { %285 = sbr.rel (%p282_p10) target bundleno = 499 (0x1f3), region = 44  ;;  %v372_v2 = vunpack.c.l.s4 (!%p282_p10), %v2391_v1  ;;  %2047 = vmatprep.subr.bf16.mxu0 (!%p282_p10), %v2392_v3  ;;  %2053 = vmatprep.subr.bf16.mxu1 (!%p282_p10), %v2392_v3  ;;  %v375_v4 = vshrl.u32 (!%p282_p10), %v374_v0, 7  ;;  %s2860_s0 = sld [smem:[#allocation8_spill]] (!%p282_p10)  ;;  %v1766_v13 = vld [vmem:[%s2843_s4] sm:$0xff] (!%p282_p10)  ;;  %v2402_v14 = vmov (!%p282_p10), 0   ;;  %vm391_vm1 = vcmask (!%p282_p10), 1041408  }
  0x18   : > { %2049 = vmatprep.mubr.msk.bf16.mxu0 (!%p282_p10), %vm2393_vm0, %v2392_v3  ;;  %2055 = vmatprep.mubr.msk.bf16.mxu1 (!%p282_p10), %vm2393_vm0, %v2392_v3  ;;  %s344_s12 = sadd.s32 (!%p282_p10), 1, %s2373_s24  ;;  %s2848_s13 = smov (!%p282_p10), 10   ;;  %v1935_v19 = vld [vmem:[%s2842_s3 + $0x4] sm:$0xf] (!%p282_p10)  ;;  %vm387_vm2 = vcmask (!%p282_p10), 31744  }
  0x19   : > { %v373_v5 = vunpack.c.0.s8 (!%p282_p10), %v372_v2  ;;  %p347_p0 = scmp.lt.s32.totalorder (!%p282_p10), %s344_s12, 9  ;;  %s2395_s14 = smov (!%p282_p10), 9   ;;  %2293 = vset.pattern.permute.xlu0 (!%p282_p10), %v2402_v14  ;;  %2294 = vset.pattern.permute.xlu1 (!%p282_p10), %v2402_v14  ;;  %v381_v24 = vld [vmem:[%s2842_s3] sm:$0xf] (!%p282_p10)  ;;  %v1938_v26 = vld [vmem:[%s2842_s3 + $0x8] sm:$0xf] (!%p282_p10) }
  0x1a   : > { %s2396_s8 = smov (!%p282_p10), 11   ;;  %s354_s29 = sadd.s32 (!%p282_p10), 2, %s2373_s24  ;;  %v1940_v29 = vld [vmem:[%s2842_s3 + $0xc] sm:$0xf] (!%p282_p10)  ;;  %v1942_v32 = vld [vmem:[%s2842_s3 + $0x10] sm:$0xf] (!%p282_p10) }
  0x1b   : > { %v376_v6 = vsub.s32 (!%p282_p10), %v373_v5, %v375_v4  ;;  %s2861_s1 = sld [smem:[#allocation9_spill]] (!%p282_p10)  ;;  %s2398_s7 = smov (!%p282_p10), 127   ;;  %v1944_v35 = vld [vmem:[%s2842_s3 + $0x14] sm:$0xf] (!%p282_p10)  ;;  %v1946_v38 = vld [vmem:[%s2842_s3 + $0x18] sm:$0xf] (!%p282_p10) }
  0x1c   : > { %p357_p1 = scmp.lt.s32.totalorder (!%p282_p10), %s354_s29, 9  ;;  %v1948_v41 = vld [vmem:[%s2842_s3 + $0x1c] sm:$0xf] (!%p282_p10)  ;;  %v1950_v44 = vld [vmem:[%s2842_s3 + $0x20] sm:$0xf] (!%p282_p10) }
  0x1d   : > { %v1952_v47 = vld [vmem:[%s2842_s3 + $0x24] sm:$0xf] (!%p282_p10)  ;;  %v1954_v50 = vld [vmem:[%s2842_s3 + $0x28] sm:$0xf] (!%p282_p10)  ;;  %v1956_v52 = vld [vmem:[%s2842_s3 + $0x2c] sm:$0xf] (!%p282_p10) }
  0x1e   : > { %s2515_s16 = scalar_select %p336_p12, %s2377_s25, 1  ;;  %v1958_v55 = vld [vmem:[%s2842_s3 + $0x30] sm:$0xf]  ;;  %v1960_v58 = vld [vmem:[%s2842_s3 + $0x34] sm:$0xf] }
  0x1f   : > { %s339_s17 = scalar_select %p338_p13, %s2373_s24, 9  ;;  %v1962_v61 = vld [vmem:[%s2842_s3 + $0x38] sm:$0xf]  ;;  %v1964_v0 = vld [vmem:[%s2842_s3 + $0x3c] sm:$0xf] }
  0x20   : > { %s2523_s18 = smul.u32 10, %s2515_s16  ;;  %s2879_s12 = smov (!%p347_p0, %s344_s12), 9  ;;  %v1966_v4 = vld [vmem:[%s2842_s3 + $0x40] sm:$0xf]  ;;  %v1972_v14 = vld [vmem:[%s2842_s3 + $0x4c] sm:$0xf] }
  0x21   : > { %s2881_s29 = smov (!%p357_p1, %s354_s29), 9 }
  0x22   : > { %s341_s19 = sadd.s32 %s2523_s18, %s339_s17  ;;  %s350_s17 = sadd.s32 %s2523_s18, %s2879_s12 }
  0x23   : > { %s1931_s20 = sshll.u32 %s341_s19, 1  ;;  %s1932_s19 = sshll.u32 %s350_s17, 1 }
  0x24   : > { %s343_s9 = scalar_lea.vmem %s2860_s0, %s1931_s20  ;;  %s2850_s20 = smov 1  }
  0x25   : > { %v2529_v7 = vld [vmem:[%s343_s9] sm:$0x3]  ;;  %s352_s0 = scalar_lea.vmem %s2861_s1, %s1932_s19  ;;  %s2400_s12 = smov 118  }
  0x26   : > { %v377_v8 = vrot.slane %v2529_v7, %v376_v6  ;;  %v2542_v9 = vld [vmem:[%s352_s0] sm:$0x3]  ;;  %s2401_s17 = smov 117   ;;  %s360_s30 = sadd.s32 %s2523_s18, %s2881_s29  ;;  %v587_v27 = vsel %vm391_vm1, %v2529_v7, 0  ;;  %v1968_v7 = vld [vmem:[%s2842_s3 + $0x44] sm:$0xf] }
  0x27   : > { %v842_v10 = vrot.slane %v2542_v9, %v376_v6  ;;  %s1933_s19 = sshll.u32 %s360_s30, 1  ;;  %s2863_s9 = smov 1   ;;  %v1053_v53 = vsel %vm391_vm1, %v2542_v9, 0 }
  0x28   : > { %382 = vrot.lane.b32.xlu0 %v377_v8, %s2848_s13  ;;  %479 = vrot.lane.b32.xlu1 %v377_v8, %s2395_s14  ;;  %s2399_s13 = smov 119   ;;  %s362_s27 = scalar_lea.vmem %s2841_s2, %s1933_s19 }
  0x29   : > { %v2553_v11 = vld [vmem:[%s362_s27] sm:$0x3]  ;;  %s1934_s27 = sshll.u32 %s2515_s16, 3  ;;  %s333_s30 = sand.u32 1, %s2365_s22  }
  0x2a   : > { %v1308_v12 = vrot.slane %v2553_v11, %v376_v6  ;;  %s1930_s19 = sshll.u32 %s333_s30, 3 }
  0x2b   : > { %s335_s18 = scalar_lea.vmem [#allocation2], %s1930_s19 }
  0x2c   : > { %378 = vrot.lane.b32.xlu0 %v377_v8, %s2396_s8  ;;  %530 = vrot.lane.b32.xlu1 %v377_v8, %s2850_s20  ;;  %s2862_s20 = smov 10  }
  0x30   : > { %630 = vrot.lane.b32.xlu0 %v377_v8, %s2398_s7  ;;  %681 = vrot.lane.b32.xlu1 %v377_v8, %s2399_s13 }
  0x34   : > { %732 = vrot.lane.b32.xlu0 %v377_v8, %s2400_s12  ;;  %783 = vrot.lane.b32.xlu1 %v377_v8, %s2401_s17 }
  0x38   : > { %843 = vrot.lane.b32.xlu0 %v842_v10, %s2396_s8  ;;  %894 = vrot.lane.b32.xlu1 %v842_v10, %s2862_s20 }
  0x3c   : > { %945 = vrot.lane.b32.xlu0 %v842_v10, %s2395_s14  ;;  %996 = vrot.lane.b32.xlu1 %v842_v10, %s2863_s9 }
  0x40   : > { %1096 = vrot.lane.b32.xlu0 %v842_v10, %s2398_s7  ;;  %1147 = vrot.lane.b32.xlu1 %v842_v10, %s2399_s13 }
  0x44   : > { %1198 = vrot.lane.b32.xlu0 %v842_v10, %s2400_s12  ;;  %1249 = vrot.lane.b32.xlu1 %v842_v10, %s2401_s17  ;;  %v1970_v10 = vld [vmem:[%s2842_s3 + $0x48] sm:$0xf] }
  0x48   : > { %1309 = vrot.lane.b32.xlu0 %v1308_v12, %s2396_s8  ;;  %1360 = vrot.lane.b32.xlu1 %v1308_v12, %s2862_s20  ;;  %s367_s20 = scalar_lea.vmem %s2844_s5, %s1934_s27  ;;  %s1799_s27 = sshll.u32 %s335_s18, 4  ;;  %s2788_s27 = int_to_ptr.vmem [resolvable:$true] %s1799_s27 }
  0x49   : > { %v1775_v15 = vld [vmem:[%s367_s20] sm:$0xff] }
  0x4c   : > { %1411 = vrot.lane.b32.xlu0 %v1308_v12, %s2395_s14  ;;  %1462 = vrot.lane.b32.xlu1 %v1308_v12, %s2863_s9  ;;  %s1989_s9 = sshll.u32 %s2377_s25, 3  ;;  %s1784_s25 = scalar_lea.sflag [#allocation3], %s333_s30 }
  0x4d   : > { %s1795_s0 = sadd.s32 %s2373_s24, %s1989_s9  ;;  %s2295_s24 = scalar_lea.vmem %s2788_s27, 128 }
  0x4e   : > { %s1990_s1 = sshll.u32 %s1795_s0, 7  ;;  %p2296_p2 = scmp.ne.s32.totalorder %s2788_s27, %s2295_s24 }
  0x4f   : > { %s2786_s20 = scalar_lea.hbm %s2845_s6, %s1990_s1 }
  0x50   : > { %1562 = vrot.lane.b32.xlu0 %v1308_v12, %s2398_s7  ;;  %1613 = vrot.lane.b32.xlu1 %v1308_v12, %s2399_s13  ;;  %p2297_p4 = pnand %p2296_p2, %p2490_p3  ;;  %s2403_s7 = smov [#allocation2]  }
  0x51   : > { %s2299_s13 = sshll.u32 %s2403_s7, 4  ;;  %s2300_s13 = int_to_ptr.vmem [resolvable:$false] %s2299_s13 }
  0x52   : > { %p2298_p5 = pneg %p2297_p4  ;;  %s2301_s16 = scalar_lea.vmem %s2300_s13, 256 }
  0x53   : > { %p2302_p6 = scmp.lt.s32.totalorder %s2788_s27, %s2300_s13  ;;  %p2303_p7 = scmp.lt.s32.totalorder %s2301_s16, %s2295_s24 }
  0x54   : > { %1664 = vrot.lane.b32.xlu0 %v1308_v12, %s2400_s12  ;;  %1715 = vrot.lane.b32.xlu1 %v1308_v12, %s2401_s17 }
  0x55   : > { %p2304_p9 = por %p2303_p7, %p2302_p6 }
  0x57   : > { %p2305_p10 = pnand %p2304_p9, %p2298_p5 }
  0x58   : > { %1769 = vperm.xlu0 %2293, %v1766_v13   ;;  %1778 = vperm.xlu1 %2294, %v1775_v15  }
  0x9a   : > { %v383_v16 = vpop.permute.xlu0 %382  ;;  %v480_v17 = vpop.permute.xlu1 %479 }
  0x9b   : > { %v392_v18 = vsel %vm391_vm1, %v383_v16, 0  ;;  %v487_v20 = vsel %vm391_vm1, %v480_v17, 0  ;;  %v1974_v16 = vld [vmem:[%s2842_s3 + $0x50] sm:$0xf]  ;;  %v1519_v17 = vsel %vm391_vm1, %v2553_v11, 0 }
  0x9c   : > { %2048 = vmatpush3.bf16.msra.mxu0 %v392_v18  ;;  %v1978_v11 = vld [vmem:[%s2842_s3 + $0x58] sm:$0xf] }
  0x9d   : > { %2059 = vmatprep.subr.bf16.mxu0 %v2392_v3 }
  0x9e   : > { %v379_v21 = vpop.permute.xlu0 %378  ;;  %v531_v22 = vpop.permute.xlu1 %530 }
  0x9f   : > { %2050 = vmatmul.mubr.msk.bf16.vlgmr.msra.gmra.mrb[0].mxu0 %vm387_vm2, %v1935_v19  ;;  %v437_v23 = vsel %vm391_vm1, %v379_v21, 0  ;;  %v538_v25 = vsel %vm391_vm1, %v531_v22, 0  ;;  %v1976_v19 = vld [vmem:[%s2842_s3 + $0x54] sm:$0xf] }
  0xa0   : > { %2054 = vmatpush3.bf16.msra.mxu1 %v437_v23  ;;  %2060 = vmatpush3.bf16.msra.mxu0 %v487_v20 }
  0xa1   : > { %2065 = vmatprep.subr.bf16.mxu1 %v2392_v3  ;;  %2061 = vmatprep.mubr.msk.bf16.mxu0 %vm2393_vm0, %v2392_v3 }
  0xa2   : > { %2071 = vmatprep.subr.bf16.mxu0 %v2392_v3  ;;  %v631_v28 = vpop.permute.xlu0 %630  ;;  %v682_v31 = vpop.permute.xlu1 %681 }
  0xa3   : > { %2056 = vmatmul.mubr.msk.bf16.vlgmr.msra.gmra.mrb[0].mxu1 %vm387_vm2, %v381_v24  ;;  %v638_v30 = vsel %vm391_vm1, %v631_v28, 0  ;;  %v689_v33 = vsel %vm391_vm1, %v682_v31, 0  ;;  %v1980_v24 = vld [vmem:[%s2842_s3 + $0x5c] sm:$0xf] }
  0xa4   : > { %2066 = vmatpush3.bf16.msra.mxu1 %v538_v25  ;;  %2067 = vmatprep.mubr.msk.bf16.mxu1 %vm2393_vm0, %v2392_v3 }
  0xa5   : > { %2077 = vmatprep.subr.bf16.mxu1 %v2392_v3 }
  0xa6   : > { %v733_v34 = vpop.permute.xlu0 %732  ;;  %v784_v37 = vpop.permute.xlu1 %783 }
  0xa7   : > { %2062 = vmatmul.mubr.msk.bf16.vlgmr.msra.gmra.mrb[4].mxu0 %vm387_vm2, %v1938_v26  ;;  %v740_v36 = vsel %vm391_vm1, %v733_v34, 0  ;;  %v791_v39 = vsel %vm391_vm1, %v784_v37, 0 }
  0xa8   : > { %2072 = vmatpush3.bf16.msra.mxu0 %v587_v27  ;;  %2073 = vmatprep.mubr.msk.bf16.mxu0 %vm2393_vm0, %v2392_v3  ;;  %v1982_v27 = vld [vmem:[%s2842_s3 + $0x60] sm:$0xf] }
  0xa9   : > { %2083 = vmatprep.subr.bf16.mxu0 %v2392_v3 }
  0xaa   : > { %v844_v40 = vpop.permute.xlu0 %843  ;;  %v895_v43 = vpop.permute.xlu1 %894 }
  0xab   : > { %2068 = vmatmul.mubr.msk.bf16.vlgmr.msra.gmra.mrb[4].mxu1 %vm387_vm2, %v1940_v29  ;;  %v851_v42 = vsel %vm391_vm1, %v844_v40, 0  ;;  %v902_v45 = vsel %vm391_vm1, %v895_v43, 0  ;;  %v1984_v29 = vld [vmem:[%s2842_s3 + $0x64] sm:$0xf] }
  0xac   : > { %2078 = vmatpush3.bf16.msra.mxu1 %v638_v30  ;;  %2079 = vmatprep.mubr.msk.bf16.mxu1 %vm2393_vm0, %v2392_v3  ;;  %v1986_v30 = vld [vmem:[%s2842_s3 + $0x68] sm:$0xf] }
  0xad   : > { %2089 = vmatprep.subr.bf16.mxu1 %v2392_v3 }
  0xae   : > { %v946_v46 = vpop.permute.xlu0 %945  ;;  %v997_v49 = vpop.permute.xlu1 %996 }
  0xaf   : > { %2074 = vmatmul.mubr.msk.bf16.vlgmr.msra.gmra.mrb[8].mxu0 %vm387_vm2, %v1942_v32  ;;  %v953_v48 = vsel %vm391_vm1, %v946_v46, 0  ;;  %v1004_v51 = vsel %vm391_vm1, %v997_v49, 0 }
  0xb0   : > { %2084 = vmatpush3.bf16.msra.mxu0 %v689_v33  ;;  %2085 = vmatprep.mubr.msk.bf16.mxu0 %vm2393_vm0, %v2392_v3 }
  0xb1   : > { %2095 = vmatprep.subr.bf16.mxu0 %v2392_v3 }
  0xb2   : > { %v1097_v54 = vpop.permute.xlu0 %1096  ;;  %v1148_v57 = vpop.permute.xlu1 %1147 }
  0xb3   : > { %2080 = vmatmul.mubr.msk.bf16.vlgmr.msra.gmra.mrb[8].mxu1 %vm387_vm2, %v1944_v35  ;;  %v1104_v56 = vsel %vm391_vm1, %v1097_v54, 0  ;;  %v1155_v59 = vsel %vm391_vm1, %v1148_v57, 0 }
  0xb4   : > { %2090 = vmatpush3.bf16.msra.mxu1 %v740_v36  ;;  %2091 = vmatprep.mubr.msk.bf16.mxu1 %vm2393_vm0, %v2392_v3 }
  0xb5   : > { %2101 = vmatprep.subr.bf16.mxu1 %v2392_v3 }
  0xb6   : > { %v1199_v60 = vpop.permute.xlu0 %1198  ;;  %v1250_v63 = vpop.permute.xlu1 %1249 }
  0xb7   : > { %2086 = vmatmul.mubr.msk.bf16.vlgmr.msra.gmra.mrb[12].mxu0 %vm387_vm2, %v1946_v38  ;;  %v1206_v62 = vsel %vm391_vm1, %v1199_v60, 0  ;;  %v1257_v1 = vsel %vm391_vm1, %v1250_v63, 0 }
  0xb8   : > { %2096 = vmatpush3.bf16.msra.mxu0 %v791_v39  ;;  %2097 = vmatprep.mubr.msk.bf16.mxu0 %vm2393_vm0, %v2392_v3 }
  0xb9   : > { %2107 = vmatprep.subr.bf16.mxu0 %v2392_v3 }
  0xba   : > { %v1310_v2 = vpop.permute.xlu0 %1309  ;;  %v1361_v6 = vpop.permute.xlu1 %1360 }
  0xbb   : > { %2092 = vmatmul.mubr.msk.bf16.vlgmr.msra.gmra.mrb[12].mxu1 %vm387_vm2, %v1948_v41  ;;  %v1317_v5 = vsel %vm391_vm1, %v1310_v2, 0  ;;  %v1368_v8 = vsel %vm391_vm1, %v1361_v6, 0 }
  0xbc   : > { %2102 = vmatpush3.bf16.msra.mxu1 %v851_v42  ;;  %2103 = vmatprep.mubr.msk.bf16.mxu1 %vm2393_vm0, %v2392_v3 }
  0xbd   : > { %2113 = vmatprep.subr.bf16.mxu1 %v2392_v3 }
  0xbe   : > { %v1412_v9 = vpop.permute.xlu0 %1411  ;;  %v1463_v13 = vpop.permute.xlu1 %1462 }
  0xbf   : > { %2098 = vmatmul.mubr.msk.bf16.vlgmr.msra.gmra.mrb[16].mxu0 %vm387_vm2, %v1950_v44  ;;  %v1419_v12 = vsel %vm391_vm1, %v1412_v9, 0  ;;  %v1470_v15 = vsel %vm391_vm1, %v1463_v13, 0 }
  0xc0   : > { %2108 = vmatpush3.bf16.msra.mxu0 %v902_v45  ;;  %2109 = vmatprep.mubr.msk.bf16.mxu0 %vm2393_vm0, %v2392_v3 }
  0xc1   : > { %2119 = vmatprep.subr.bf16.mxu0 %v2392_v3 }
  0xc2   : > { %v1563_v18 = vpop.permute.xlu0 %1562  ;;  %v1614_v21 = vpop.permute.xlu1 %1613 }
  0xc3   : > { %2104 = vmatmul.mubr.msk.bf16.vlgmr.msra.gmra.mrb[16].mxu1 %vm387_vm2, %v1952_v47  ;;  %v1570_v20 = vsel %vm391_vm1, %v1563_v18, 0  ;;  %v1621_v22 = vsel %vm391_vm1, %v1614_v21, 0 }
  0xc4   : > { %2114 = vmatpush3.bf16.msra.mxu1 %v953_v48  ;;  %2115 = vmatprep.mubr.msk.bf16.mxu1 %vm2393_vm0, %v2392_v3 }
  0xc5   : > { %2125 = vmatprep.subr.bf16.mxu1 %v2392_v3 }
  0xc6   : > { %v1665_v23 = vpop.permute.xlu0 %1664  ;;  %v1716_v26 = vpop.permute.xlu1 %1715 }
  0xc7   : > { %2110 = vmatmul.mubr.msk.bf16.vlgmr.msra.gmra.mrb[20].mxu0 %vm387_vm2, %v1954_v50  ;;  %v1672_v25 = vsel %vm391_vm1, %v1665_v23, 0  ;;  %v1723_v28 = vsel %vm391_vm1, %v1716_v26, 0 }
  0xc8   : > { %2120 = vmatpush3.bf16.msra.mxu0 %v1004_v51  ;;  %2121 = vmatprep.mubr.msk.bf16.mxu0 %vm2393_vm0, %v2392_v3 }
  0xc9   : > { %2131 = vmatprep.subr.bf16.mxu0 %v2392_v3 }
  0xcb   : > { %2116 = vmatmul.mubr.msk.bf16.vlgmr.msra.gmra.mrb[20].mxu1 %vm387_vm2, %v1956_v52 }
  0xcc   : > { %2126 = vmatpush3.bf16.msra.mxu1 %v1053_v53  ;;  %2127 = vmatprep.mubr.msk.bf16.mxu1 %vm2393_vm0, %v2392_v3 }
  0xcd   : > { %2137 = vmatprep.subr.bf16.mxu1 %v2392_v3 }
  0xcf   : > { %2122 = vmatmul.mubr.msk.bf16.vlgmr.msra.gmra.mrb[24].mxu0 %vm387_vm2, %v1958_v55 }
  0xd0   : > { %2132 = vmatpush3.bf16.msra.mxu0 %v1104_v56  ;;  %2133 = vmatprep.mubr.msk.bf16.mxu0 %vm2393_vm0, %v2392_v3 }
  0xd1   : > { %2143 = vmatprep.subr.bf16.mxu0 %v2392_v3 }
  0xd3   : > { %2128 = vmatmul.mubr.msk.bf16.vlgmr.msra.gmra.mrb[24].mxu1 %vm387_vm2, %v1960_v58 }
  0xd4   : > { %2138 = vmatpush3.bf16.msra.mxu1 %v1155_v59  ;;  %2139 = vmatprep.mubr.msk.bf16.mxu1 %vm2393_vm0, %v2392_v3 }
  0xd5   : > { %2149 = vmatprep.subr.bf16.mxu1 %v2392_v3 }
  0xd7   : > { %2134 = vmatmul.mubr.msk.bf16.vlgmr.msra.gmra.mrb[28].mxu0 %vm387_vm2, %v1962_v61 }
  0xd8   : > { %2144 = vmatpush3.bf16.msra.mxu0 %v1206_v62  ;;  %2145 = vmatprep.mubr.msk.bf16.mxu0 %vm2393_vm0, %v2392_v3 }
  0xd9   : > { %2155 = vmatprep.subr.bf16.mxu0 %v2392_v3 }
  0xdb   : > { %2140 = vmatmul.mubr.msk.bf16.vlgmr.msra.gmra.mrb[28].mxu1 %vm387_vm2, %v1964_v0 }
  0xdc   : > { %2150 = vmatpush3.bf16.msra.mxu1 %v1257_v1  ;;  %2151 = vmatprep.mubr.msk.bf16.mxu1 %vm2393_vm0, %v2392_v3 }
  0xdd   : > { %2161 = vmatprep.subr.bf16.mxu1 %v2392_v3 }
  0xdf   : > { %2146 = vmatmul.mubr.msk.bf16.vlgmr.msra.gmra.mrb[32].mxu0 %vm387_vm2, %v1966_v4 }
  0xe0   : > { %2156 = vmatpush3.bf16.msra.mxu0 %v1317_v5  ;;  %2157 = vmatprep.mubr.msk.bf16.mxu0 %vm2393_vm0, %v2392_v3 }
  0xe1   : > { %2167 = vmatprep.subr.bf16.mxu0 %v2392_v3 }
  0xe3   : > { %2152 = vmatmul.mubr.msk.bf16.vlgmr.msra.gmra.mrb[32].mxu1 %vm387_vm2, %v1968_v7 }
  0xe4   : > { %2162 = vmatpush3.bf16.msra.mxu1 %v1368_v8  ;;  %2163 = vmatprep.mubr.msk.bf16.mxu1 %vm2393_vm0, %v2392_v3 }
  0xe5   : > { %2173 = vmatprep.subr.bf16.mxu1 %v2392_v3 }
  0xe7   : > { %2158 = vmatmul.mubr.msk.bf16.vlgmr.msra.gmra.mrb[36].mxu0 %vm387_vm2, %v1970_v10 }
  0xe8   : > { %2168 = vmatpush3.bf16.msra.mxu0 %v1419_v12  ;;  %2169 = vmatprep.mubr.msk.bf16.mxu0 %vm2393_vm0, %v2392_v3 }
  0xe9   : > { %2179 = vmatprep.subr.bf16.mxu0 %v2392_v3 }
  0xeb   : > { %2164 = vmatmul.mubr.msk.bf16.vlgmr.msra.gmra.mrb[36].mxu1 %vm387_vm2, %v1972_v14 }
  0xec   : > { %2174 = vmatpush3.bf16.msra.mxu1 %v1470_v15  ;;  %2175 = vmatprep.mubr.msk.bf16.mxu1 %vm2393_vm0, %v2392_v3 }
  0xed   : > { %2185 = vmatprep.subr.bf16.mxu1 %v2392_v3 }
  0xef   : > { %2170 = vmatmul.mubr.msk.bf16.vlgmr.msra.gmra.mrb[40].mxu0 %vm387_vm2, %v1974_v16 }
  0xf0   : > { %2180 = vmatpush3.bf16.msra.mxu0 %v1519_v17  ;;  %2181 = vmatprep.mubr.msk.bf16.mxu0 %vm2393_vm0, %v2392_v3 }
  0xf1   : > { %2191 = vmatprep.subr.bf16.mxu0 %v2392_v3 }
  0xf3   : > { %2176 = vmatmul.mubr.msk.bf16.vlgmr.msra.gmra.mrb[40].mxu1 %vm387_vm2, %v1976_v19 }
  0xf4   : > { %2186 = vmatpush3.bf16.msra.mxu1 %v1570_v20  ;;  %2187 = vmatprep.mubr.msk.bf16.mxu1 %vm2393_vm0, %v2392_v3 }
  0xf5   : > { %2197 = vmatprep.subr.bf16.mxu1 %v2392_v3 }
  0xf7   : > { %2182 = vmatmul.mubr.msk.bf16.vlgmr.msra.gmra.mrb[44].mxu0 %vm387_vm2, %v1978_v11 }
  0xf8   : > { %2192 = vmatpush3.bf16.msra.mxu0 %v1621_v22  ;;  %2193 = vmatprep.mubr.msk.bf16.mxu0 %vm2393_vm0, %v2392_v3 }
  0xf9   : > { %2203 = vmatprep.subr.bf16.mxu0 %v2392_v3 }
  0xfb   : > { %2188 = vmatmul.mubr.msk.bf16.vlgmr.msra.gmra.mrb[44].mxu1 %vm387_vm2, %v1980_v24 }
  0xfc   : > { %2198 = vmatpush3.bf16.msra.mxu1 %v1672_v25  ;;  %2199 = vmatprep.mubr.msk.bf16.mxu1 %vm2393_vm0, %v2392_v3 }
  0xff   : > { %2194 = vmatmul.mubr.msk.bf16.vlgmr.msra.gmra.mrb[48].mxu0 %vm387_vm2, %v1982_v27 }
 0x100   : > { %2204 = vmatpush3.bf16.msra.mxu0 %v1723_v28  ;;  %2205 = vmatprep.mubr.msk.bf16.mxu0 %vm2393_vm0, %v2392_v3 }
 0x103   : > { %2200 = vmatmul.mubr.msk.bf16.vlgmr.msra.gmra.mrb[48].mxu1 %vm387_vm2, %v1984_v29 }
 0x107   : > { %2206 = vmatmul.mubr.msk.bf16.vlgmr.msra.gmra.mrb[52].mxu0 %vm387_vm2, %v1986_v30 }
 0x172   : > { %v428_v31 = vpop.f32.mrb[0].mxu0 }
 0x173   : > { %v2051_v32 = vpop.f32.mrb[1].mxu0 }
 0x174   : > { %v431_v33 = vpop.f32.mrb[2].mxu0 }
 0x175   : > { %v2052_v34 = vpop.f32.mrb[3].mxu0 }
 0x176   : > { %v473_v35 = vpop.f32.mrb[0].mxu1 }
 0x177   : > { %v474_v36 = vadd.f32 %v473_v35, %v428_v31  ;;  %v2057_v37 = vpop.f32.mrb[1].mxu1 }
 0x178   : > { %v476_v38 = vpop.f32.mrb[2].mxu1 }
 0x179   : > { %v2058_v39 = vpop.f32.mrb[3].mxu1 }
 0x17a   : > { %v523_v40 = vpop.f32.mrb[4].mxu0 }
 0x17b   : > { %v529_v41 = vadd.f32 %v523_v40, %v474_v36  ;;  %v2063_v3 = vpop.f32.mrb[5].mxu0 }
 0x17c   : > { %v526_v42 = vpop.f32.mrb[6].mxu0 }
 0x17d   : > { %v2064_v43 = vpop.f32.mrb[7].mxu0 }
 0x17e   : > { %v574_v44 = vpop.f32.mrb[4].mxu1 }
 0x17f   : > { %v580_v45 = vadd.f32 %v574_v44, %v529_v41  ;;  %v2069_v46 = vpop.f32.mrb[5].mxu1 }
 0x180   : > { %v577_v47 = vpop.f32.mrb[6].mxu1 }
 0x181   : > { %v2070_v48 = vpop.f32.mrb[7].mxu1 }
 0x182   : > { %v623_v49 = vpop.f32.mrb[8].mxu0 }
 0x183   : > { %v629_v50 = vadd.f32 %v623_v49, %v580_v45  ;;  %v2075_v51 = vpop.f32.mrb[9].mxu0 }
 0x184   : > { %v626_v52 = vpop.f32.mrb[10].mxu0 }
 0x185   : > { %v2076_v53 = vpop.f32.mrb[11].mxu0 }
 0x186   : > { %v674_v54 = vpop.f32.mrb[8].mxu1 }
 0x187   : > { %v680_v55 = vadd.f32 %v674_v54, %v629_v50  ;;  %v2081_v56 = vpop.f32.mrb[9].mxu1 }
 0x188   : > { %v677_v57 = vpop.f32.mrb[10].mxu1 }
 0x189   : > { %v2082_v58 = vpop.f32.mrb[11].mxu1 }
 0x18a   : > { %v725_v59 = vpop.f32.mrb[12].mxu0 }
 0x18b   : > { %v731_v60 = vadd.f32 %v725_v59, %v680_v55  ;;  %v2087_v61 = vpop.f32.mrb[13].mxu0 }
 0x18c   : > { %v728_v62 = vpop.f32.mrb[14].mxu0 }
 0x18d   : > { %v2088_v63 = vpop.f32.mrb[15].mxu0 }
 0x18e   : > { %v776_v0 = vpop.f32.mrb[12].mxu1 }
 0x18f   : > { %v782_v1 = vadd.f32 %v776_v0, %v731_v60  ;;  %v2093_v2 = vpop.f32.mrb[13].mxu1 }
 0x190   : > { %v779_v4 = vpop.f32.mrb[14].mxu1 }
 0x191   : > { %v2094_v5 = vpop.f32.mrb[15].mxu1 }
 0x192   : > { %v827_v6 = vpop.f32.mrb[16].mxu0 }
 0x193   : > { %v833_v7 = vadd.f32 %v827_v6, %v782_v1  ;;  %v2099_v8 = vpop.f32.mrb[17].mxu0 }
 0x194   : > { %v830_v9 = vpop.f32.mrb[18].mxu0 }
 0x195   : > { %v2100_v10 = vpop.f32.mrb[19].mxu0 }
 0x196   : > { %v887_v12 = vpop.f32.mrb[16].mxu1 }
 0x197   : > { %v893_v13 = vadd.f32 %v887_v12, %v833_v7  ;;  %v2105_v14 = vpop.f32.mrb[17].mxu1 }
 0x198   : > { %v890_v15 = vpop.f32.mrb[18].mxu1 }
 0x199   : > { %v2106_v16 = vpop.f32.mrb[19].mxu1 }
 0x19a   : > { %v938_v17 = vpop.f32.mrb[20].mxu0 }
 0x19b   : > { %v944_v18 = vadd.f32 %v938_v17, %v893_v13  ;;  %v2111_v19 = vpop.f32.mrb[21].mxu0 }
 0x19c   : > { %v941_v20 = vpop.f32.mrb[22].mxu0 }
 0x19d   : > { %v2112_v21 = vpop.f32.mrb[23].mxu0 }
 0x19e   : > { %v989_v11 = vpop.f32.mrb[20].mxu1 }
 0x19f   : > { %v995_v22 = vadd.f32 %v989_v11, %v944_v18  ;;  %v2117_v23 = vpop.f32.mrb[21].mxu1 }
 0x1a0   : > { %v992_v24 = vpop.f32.mrb[22].mxu1 }
 0x1a1   : > { %v2118_v25 = vpop.f32.mrb[23].mxu1 }
 0x1a2   : > { %v1040_v26 = vpop.f32.mrb[24].mxu0 }
 0x1a3   : > { %v1046_v27 = vadd.f32 %v1040_v26, %v995_v22  ;;  %v2123_v28 = vpop.f32.mrb[25].mxu0 }
 0x1a4   : > { %v1043_v29 = vpop.f32.mrb[26].mxu0 }
 0x1a5   : > { %v2124_v30 = vpop.f32.mrb[27].mxu0 }
 0x1a6   : > { %v1089_v31 = vpop.f32.mrb[24].mxu1 }
 0x1a7   : > { %v1095_v32 = vadd.f32 %v1089_v31, %v1046_v27  ;;  %v2129_v33 = vpop.f32.mrb[25].mxu1 }
 0x1a8   : > { %v1092_v34 = vpop.f32.mrb[26].mxu1  ;;  %v1770_v33 = vpop.permute.xlu0 %1769 }
 0x1a9   : > { %v2130_v35 = vpop.f32.mrb[27].mxu1 }
 0x1aa   : > { %v1140_v36 = vpop.f32.mrb[28].mxu0 }
 0x1ab   : > { %v1146_v37 = vadd.f32 %v1140_v36, %v1095_v32  ;;  %v2135_v38 = vpop.f32.mrb[29].mxu0 }
 0x1ac   : > { %v1143_v39 = vpop.f32.mrb[30].mxu0 }
 0x1ad   : > { %v2136_v40 = vpop.f32.mrb[31].mxu0 }
 0x1ae   : > { %v1191_v41 = vpop.f32.mrb[28].mxu1  ;;  %v1779_v40 = vpop.permute.xlu1 %1778 }
 0x1af   : > { %v1197_v3 = vadd.f32 %v1191_v41, %v1146_v37  ;;  %v2141_v42 = vpop.f32.mrb[29].mxu1 }
 0x1b0   : > { %v1194_v43 = vpop.f32.mrb[30].mxu1 }
 0x1b1   : > { %v2142_v44 = vpop.f32.mrb[31].mxu1 }
 0x1b2   : > { %v1242_v45 = vpop.f32.mrb[32].mxu0 }
 0x1b3   : > { %v1248_v46 = vadd.f32 %v1242_v45, %v1197_v3  ;;  %v2147_v47 = vpop.f32.mrb[33].mxu0 }
 0x1b4   : > { %v1245_v48 = vpop.f32.mrb[34].mxu0 }
 0x1b5   : > { %v2148_v49 = vpop.f32.mrb[35].mxu0 }
 0x1b6   : > { %v1293_v50 = vpop.f32.mrb[32].mxu1 }
 0x1b7   : > { %v1299_v51 = vadd.f32 %v1293_v50, %v1248_v46  ;;  %v2153_v52 = vpop.f32.mrb[33].mxu1 }
 0x1b8   : > { %v1296_v53 = vpop.f32.mrb[34].mxu1 }
 0x1b9   : > { %v2154_v54 = vpop.f32.mrb[35].mxu1 }
 0x1ba   : > { %v1353_v55 = vpop.f32.mrb[36].mxu0 }
 0x1bb   : > { %v1359_v56 = vadd.f32 %v1353_v55, %v1299_v51  ;;  %v2159_v57 = vpop.f32.mrb[37].mxu0 }
 0x1bc   : > { %v1356_v58 = vpop.f32.mrb[38].mxu0 }
 0x1bd   : > { %v2160_v59 = vpop.f32.mrb[39].mxu0 }
 0x1be   : > { %v1404_v60 = vpop.f32.mrb[36].mxu1 }
 0x1bf   : > { %v1410_v61 = vadd.f32 %v1404_v60, %v1359_v56  ;;  %v2165_v62 = vpop.f32.mrb[37].mxu1 }
 0x1c0   : > { %v1407_v63 = vpop.f32.mrb[38].mxu1 }
 0x1c1   : > { %v2166_v0 = vpop.f32.mrb[39].mxu1 }
 0x1c2   : > { %v1455_v1 = vpop.f32.mrb[40].mxu0 }
 0x1c3   : > { %v1461_v2 = vadd.f32 %v1455_v1, %v1410_v61  ;;  %v2171_v4 = vpop.f32.mrb[41].mxu0 }
 0x1c4   : > { %v1458_v5 = vpop.f32.mrb[42].mxu0 }
 0x1c5   : > { %v2172_v6 = vpop.f32.mrb[43].mxu0 }
 0x1c6   : > { %v1506_v7 = vpop.f32.mrb[40].mxu1 }
 0x1c7   : > { %v1512_v8 = vadd.f32 %v1506_v7, %v1461_v2  ;;  %v2177_v9 = vpop.f32.mrb[41].mxu1 }
 0x1c8   : > { %v1509_v10 = vpop.f32.mrb[42].mxu1 }
 0x1c9   : > { %v2178_v12 = vpop.f32.mrb[43].mxu1 }
 0x1ca   : > { %v1555_v13 = vpop.f32.mrb[44].mxu0 }
 0x1cb   : > { %v1561_v14 = vadd.f32 %v1555_v13, %v1512_v8  ;;  %v2183_v15 = vpop.f32.mrb[45].mxu0 }
 0x1cc   : > { %v1558_v16 = vpop.f32.mrb[46].mxu0 }
 0x1cd   : > { %v2184_v17 = vpop.f32.mrb[47].mxu0 }
 0x1ce   : > { %v1606_v18 = vpop.f32.mrb[44].mxu1 }
 0x1cf   : > { %v1612_v19 = vadd.f32 %v1606_v18, %v1561_v14  ;;  %v2189_v20 = vpop.f32.mrb[45].mxu1 }
 0x1d0   : > { %v1609_v21 = vpop.f32.mrb[46].mxu1 }
 0x1d1   : > { %v2190_v11 = vpop.f32.mrb[47].mxu1 }
 0x1d2   : > { %v1657_v22 = vpop.f32.mrb[48].mxu0 }
 0x1d3   : > { %v1663_v23 = vadd.f32 %v1657_v22, %v1612_v19  ;;  %v2195_v24 = vpop.f32.mrb[49].mxu0 }
 0x1d4   : > { %v1660_v25 = vpop.f32.mrb[50].mxu0 }
 0x1d5   : > { %v2196_v26 = vpop.f32.mrb[51].mxu0 }
 0x1d6   : > { %v1708_v27 = vpop.f32.mrb[48].mxu1 }
 0x1d7   : > { %v1714_v28 = vadd.f32 %v1708_v27, %v1663_v23  ;;  %v2201_v29 = vpop.f32.mrb[49].mxu1 }
 0x1d8   : > { %v1711_v30 = vpop.f32.mrb[50].mxu1 }
 0x1d9   : > { %v2202_v31 = vpop.f32.mrb[51].mxu1 }
 0x1da   : > { %v1759_v32 = vpop.f32.mrb[52].mxu0 }
 0x1db   : > { %v1765_v34 = vadd.f32 %v1759_v32, %v1714_v28  ;;  %v2207_v35 = vpop.f32.mrb[53].mxu0 }
 0x1dc   : > { %v1762_v36 = vpop.f32.mrb[54].mxu0 }
 0x1dd   : > { %v1772_v37 = vadd.f32 %v1770_v33, %v1765_v34  ;;  %v2208_v38 = vpop.f32.mrb[55].mxu0 }
 0x1df   : > { %v1773_v39 = vmul.f32 0.1, %v1772_v37 }
 0x1e1   : > { %v1774_v41 = vmax.f32 %v1772_v37, %v1773_v39 }
 0x1e3   : > { %v1781_v3 = vadd.f32 %v1779_v40, %v1774_v41 }
 0x1e5   : > { %1782 = vst [vmem:[%s335_s18] sm:$0xff] %v1781_v3 }
 0x1e6   : > { %2308 = shalt.err (!%p2305_p10)
}
 0x1e7   : > { %s2309_s14 = scalar_lea.hbm %s2786_s20, 128  ;;  %s2313_s30 = scalar_lea.hbm %s2845_s6, 2048 }
 0x1e8   : > { %p2310_p11 = scmp.ne.s32.totalorder %s2786_s20, %s2309_s14  ;;  %p2314_p0 = scmp.lt.u32.totalorder %s2786_s20, %s2845_s6 }
 0x1e9   : > { %p2315_p1 = scmp.lt.u32.totalorder %s2313_s30, %s2309_s14  ;;  %p2317_p4 = scmp.lt.u32.totalorder %s2309_s14, %s2786_s20 }
 0x1ea   : > { %p2311_p12 = pnand %p2310_p11, %p2490_p3 }
 0x1eb   : > { %p2316_p2 = por %p2315_p1, %p2314_p0 }
 0x1ec   : > { %p2312_p13 = pneg %p2311_p12 }
 0x1ed   : > { %p2318_p5 = por %p2317_p4, %p2316_p2 }
 0x1ef   : > { %p2319_p6 = pnand %p2318_p5, %p2312_p13 }
 0x1f1   : > { %2322 = shalt.err (!%p2319_p6)
}
 0x1f2   : > { %2210 = dma.vmem_to_hbm [thread:$0]  (%p2490_p3), %s2788_s27, 128, %s2786_s20, %s1784_s25  }
 0x1f3 PF: > { %p2216_p7 = scmp.ge.s32.totalorder %s2389_s28, 2  ;;  %s1811_s0 = sand.u32 1, %s2361_s21  }
 0x1f4   : > { %s1812_s1 = scalar_lea.sflag [#allocation3], %s1811_s0 }
 0x1f5   : > { %p2213_p9 = pnand %p2216_p7, %p2499_p8 }
 0x1f7   : > { %2356 = dma.done.wait (!%p2213_p9), %s1812_s1, 128  }
 0x1f8   : > { %2358 = vsyncadd (!%p2213_p9), %s1812_s1, 4294967168  ;;  %s19_s28 = sadd.s32 1, %s2389_s28   ;;  %s2864_s25 = sld [smem:[#allocation5_spill]] }
 0x1f9   : > { %p16_p10 = scmp.ge.s32.totalorder %s19_s28, 18   ;;  %s2865_s10 = sld [smem:[#allocation6_spill]] }
 0x1fa   : > { %s2866_s27 = sld [smem:[#allocation7_spill]]  ;;  %s2867_s21 = smov %s2365_s22 }
 0x1fb   : > { %s2868_s22 = smov %s2369_s23  ;;  %s2869_s23 = smov %s2508_s15 }
 0x1fc   : > { %s2870_s24 = smov %s2381_s26  ;;  %18 = sbr.rel (!%p16_p10) target bundleno = 8 (0x8), region = 114 }
 0x1ff   : > { %s2871_s26 = smov %s2865_s10 }
 0x203   :  { %1817 = vsyncpa [#allocation3], 1 }
 0x204   :  { %1819 = vsyncpa [#allocation3 + $0x1], 1 }

</bundles_post_ra>
